<compile_context>
chip_gen: v6e
topology: v6e:2x2x1
jax: 0.10.0
libtpu: 0.0.40
codegen_flags: <defaults>
</compile_context>

<pallas_src>
import functools

import jax
import jax.numpy as jnp
import numpy as np
from jax.experimental import pallas as pl
from jax.experimental.pallas import tpu as pltpu


# ----------------------------------------------------------------------------
# bf16_3x helpers: a (f32) ~= hi + lo with hi, lo in bf16 (rel. err ~2^-17),
# so a @ b ~= hi_a@hi_b + hi_a@lo_b + lo_a@hi_b  (3 native bf16 MXU matmuls).
# ----------------------------------------------------------------------------
def _split_f32(a):
    hi = a.astype(jnp.bfloat16)
    lo = (a - hi.astype(jnp.float32)).astype(jnp.bfloat16)
    return hi, lo


def _dot3(a_hi, a_lo, b_hi, b_lo):
    dot = functools.partial(jnp.dot, preferred_element_type=jnp.float32)
    return dot(a_hi, b_hi) + dot(a_hi, b_lo) + dot(a_lo, b_hi)


# ----------------------------------------------------------------------------
# Kernel: operates on an (H, NB*W) f32 slab (NB images packed along lanes).
# DFT matrices arrive pre-split into bf16 hi/lo halves; the W-direction ones
# are block-diagonal so a single 2-D matmul transforms all NB images at once.
# ----------------------------------------------------------------------------
def _dc_kernel(x_ref, under_ref, mask_ref,
               chh_ref, chl_ref, shh_ref, shl_ref,
               cwh_ref, cwl_ref, swh_ref, swl_ref,
               out_ref, *, inv_hw):
    chh, chl = chh_ref[...], chl_ref[...]
    shh, shl = shh_ref[...], shl_ref[...]
    cwh, cwl = cwh_ref[...], cwl_ref[...]
    swh, swl = swh_ref[...], swl_ref[...]

    xh, xl = _split_f32(x_ref[...])

    # Forward DFT:  K = F_H @ x @ F_W,  F = C - i*S  (x is real)
    ar = _dot3(chh, chl, xh, xl)            # cos_H @ x
    ai = -_dot3(shh, shl, xh, xl)           # -sin_H @ x
    arh, arl = _split_f32(ar)
    aih, ail = _split_f32(ai)
    kr = _dot3(arh, arl, cwh, cwl) + _dot3(aih, ail, swh, swl)
    ki = _dot3(aih, ail, cwh, cwl) - _dot3(arh, arl, swh, swl)

    # Keep only the non-sampled frequencies of the reconstruction.
    inv_m = 1.0 - mask_ref[...]
    kr = inv_m * kr
    ki = inv_m * ki

    # Inverse DFT:  delta = real(G_H @ K @ G_W) / (H*W),  G = C + i*S
    krh, krl = _split_f32(kr)
    kih, kil = _split_f32(ki)
    br = _dot3(chh, chl, krh, krl) - _dot3(shh, shl, kih, kil)
    bi = _dot3(chh, chl, kih, kil) + _dot3(shh, shl, krh, krl)
    brh, brl = _split_f32(br)
    bih, bil = _split_f32(bi)
    delta = (_dot3(brh, brl, cwh, cwl) - _dot3(bih, bil, swh, swl)) * inv_hw

    # x_out = under_img + real(ifft2((1-m) * fft2(x_rec)))
    # (exact rewrite of real(ifft2(fft2(under) + (1-m)*fft2(x_rec))))
    out_ref[...] = (under_ref[...] + delta).astype(out_ref.dtype)


# ----------------------------------------------------------------------------
# Host-side helpers.
# ----------------------------------------------------------------------------
def _dft_cos_sin(n):
    idx = np.arange(n, dtype=np.float64)
    ang = 2.0 * np.pi * np.mod(np.outer(idx, idx), float(n)) / float(n)
    return np.cos(ang).astype(np.float32), np.sin(ang).astype(np.float32)


def _split_host(m_np):
    m = jnp.asarray(m_np, dtype=jnp.float32)
    hi = m.astype(jnp.bfloat16)
    lo = (m - hi.astype(jnp.float32)).astype(jnp.bfloat16)
    return hi, lo


def _pick_batch(n, h, w, vmem_budget_bytes):
    """Images packed per grid step: smallest divisor of n that makes the lane
    dim (nb*w) >= 128 and fits the VMEM budget; otherwise the largest divisor
    that fits.  Conservative budget keeps us safe on v7x's 64 MiB VMEM."""
    def vmem_estimate(nb):
        nbw = nb * w
        slab = 4 * h * nbw                       # one f32 (H, NB*W) slab
        mats = 8 * (h * h + nbw * nbw)           # bf16 hi/lo DFT matrices
        return 24 * slab + 2 * mats              # pipeline bufs + intermediates

    divisors = [d for d in range(1, n + 1) if n % d == 0]
    for nb in divisors:                          # prefer lane-dense (>= 128)
        if nb * w >= 128 and vmem_estimate(nb) <= vmem_budget_bytes:
            return nb
    best = 1
    for nb in divisors:                          # otherwise: largest that fits
        if vmem_estimate(nb) <= vmem_budget_bytes:
            best = nb
    return best


def data_consistency(x_rec, under_img, sub_mask, *,
                     vmem_budget_bytes=24 * 1024 * 1024,
                     vmem_limit_bytes=48 * 1024 * 1024):
    """x_rec, under_img: (N, 1, H, W) float32; sub_mask: (N, H, W, 1) float32.
    Returns (N, 1, H, W) float32."""
    n, c, h, w = x_rec.shape
    assert c == 1, "module semantics assume single-channel (real) images"

    xr = x_rec[:, 0, :, :].astype(jnp.float32)       # (N, H, W)
    ui = under_img[:, 0, :, :].astype(jnp.float32)   # (N, H, W)
    mk = sub_mask[:, :, :, 0].astype(jnp.float32)    # (N, H, W)

    nb = _pick_batch(n, h, w, vmem_budget_bytes)
    ng = n // nb
    nbw = nb * w

    def to_slab(a):   # (N, H, W) -> (NG, H, NB*W): images packed along lanes
        return a.reshape(ng, nb, h, w).transpose(0, 2, 1, 3).reshape(ng, h, nbw)

    xs, us, ms = to_slab(xr), to_slab(ui), to_slab(mk)

    ch_np, sh_np = _dft_cos_sin(h)
    cw_np, sw_np = _dft_cos_sin(w)
    if nb > 1:        # block-diagonal W-direction DFT acting on the packed slab
        eye = np.eye(nb, dtype=np.float32)
        cw_np = np.kron(eye, cw_np)
        sw_np = np.kron(eye, sw_np)
    chh, chl = _split_host(ch_np)
    shh, shl = _split_host(sh_np)
    cwh, cwl = _split_host(cw_np)
    swh, swl = _split_host(sw_np)

    img_spec = pl.BlockSpec((pl.Squeezed(), h, nbw), lambda g: (g, 0, 0))
    # Constant index_map -> the constant DFT matrices are DMA'd once and reused.
    math_spec = pl.BlockSpec((h, h), lambda g: (0, 0))
    matw_spec = pl.BlockSpec((nbw, nbw), lambda g: (0, 0))

    flops = int(36 * ng * h * nbw * (h + nbw))              # 36 bf16 MXU matmuls/step
    bytes_accessed = int(16 * n * h * w + 8 * (h * h + nbw * nbw))

    out = pl.pallas_call(
        functools.partial(_dc_kernel, inv_hw=1.0 / float(h * w)),
        out_shape=jax.ShapeDtypeStruct((ng, h, nbw), jnp.float32),
        grid_spec=pltpu.PrefetchScalarGridSpec(
            num_scalar_prefetch=0,
            grid=(ng,),
            in_specs=[img_spec, img_spec, img_spec,
                      math_spec, math_spec, math_spec, math_spec,
                      matw_spec, matw_spec, matw_spec, matw_spec],
            out_specs=img_spec,
        ),
        compiler_params=pltpu.CompilerParams(
            dimension_semantics=("parallel",),
            vmem_limit_bytes=vmem_limit_bytes),
        cost_estimate=pl.CostEstimate(flops=flops, transcendentals=0,
                                      bytes_accessed=bytes_accessed),
    )(xs, us, ms, chh, chl, shh, shl, cwh, cwl, swh, swl)

    out = out.reshape(ng, h, nb, w).transpose(0, 2, 1, 3).reshape(n, h, w)
    return out[:, None, :, :]                               # back to NCHW


def _reference(x_rec, under_img, sub_mask):
    # Pure-JAX reference mirroring the PyTorch forward (fft-based).
    x = x_rec[:, 0, :, :].astype(jnp.float32)
    u = under_img[:, 0, :, :].astype(jnp.float32)
    m = sub_mask[:, :, :, 0].astype(jnp.float32)
    under_k = jnp.fft.fft2(x) * (1.0 - m)
    x_k = jnp.fft.fft2(u)
    x_out = jnp.real(jnp.fft.ifft2(x_k + under_k))
    return x_out[:, None, :, :].astype(jnp.float32)


if __name__ == "__main__":
    key = jax.random.PRNGKey(0)
    k1, k2, k3 = jax.random.split(key, 3)

    # Small demo shapes; N=16, W=16 exercises the lane-packing (NB=8 -> 128
    # lanes) and a multi-step grid (NG=2).
    N, C, H, W = 16, 1, 16, 16
    x_rec = jax.random.normal(k1, (N, C, H, W), dtype=jnp.float32)
    under_img = jax.random.normal(k2, (N, C, H, W), dtype=jnp.float32)
    sub_mask = (jax.random.uniform(k3, (N, H, W, 1)) > 0.5).astype(jnp.float32)

    out = data_consistency(x_rec, under_img, sub_mask)
    jax.block_until_ready(out)

    ref = _reference(x_rec, under_img, sub_mask)
    np.testing.assert_allclose(np.asarray(out), np.asarray(ref),
                               rtol=1e-3, atol=1e-3)
    print("KERNEL_OK")
</pallas_src>

<mosaic_0001>
module attributes {stable_mosaic.version = 11 : i64} {
  func.func @_dc_kernel(%arg0: i32, %arg1: memref<1x16x128xf32, #tpu.memory_space<vmem>>, %arg2: memref<1x16x128xf32, #tpu.memory_space<vmem>>, %arg3: memref<1x16x128xf32, #tpu.memory_space<vmem>>, %arg4: memref<16x16xbf16, #tpu.memory_space<vmem>>, %arg5: memref<16x16xbf16, #tpu.memory_space<vmem>>, %arg6: memref<16x16xbf16, #tpu.memory_space<vmem>>, %arg7: memref<16x16xbf16, #tpu.memory_space<vmem>>, %arg8: memref<128x128xbf16, #tpu.memory_space<vmem>>, %arg9: memref<128x128xbf16, #tpu.memory_space<vmem>>, %arg10: memref<128x128xbf16, #tpu.memory_space<vmem>>, %arg11: memref<128x128xbf16, #tpu.memory_space<vmem>>, %arg12: memref<1x16x128xf32, #tpu.memory_space<vmem>>) attributes {dimension_semantics = [#tpu.dimension_semantics<parallel>], iteration_bounds = array<i64: 2>, scalar_prefetch = 0 : i64, scratch_operands = 0 : i64, tpu.core_type = #tpu.core_type<tc>, window_params = [{transform_indices = @transform_0, window_bounds = array<i64: 1, 16, 128>}, {transform_indices = @transform_1, window_bounds = array<i64: 1, 16, 128>}, {transform_indices = @transform_2, window_bounds = array<i64: 1, 16, 128>}, {pipeline_mode = #tpu.pipeline_mode<synchronous>, transform_indices = @transform_3, window_bounds = array<i64: 16, 16>}, {pipeline_mode = #tpu.pipeline_mode<synchronous>, transform_indices = @transform_4, window_bounds = array<i64: 16, 16>}, {pipeline_mode = #tpu.pipeline_mode<synchronous>, transform_indices = @transform_5, window_bounds = array<i64: 16, 16>}, {pipeline_mode = #tpu.pipeline_mode<synchronous>, transform_indices = @transform_6, window_bounds = array<i64: 16, 16>}, {pipeline_mode = #tpu.pipeline_mode<synchronous>, transform_indices = @transform_7, window_bounds = array<i64: 128, 128>}, {pipeline_mode = #tpu.pipeline_mode<synchronous>, transform_indices = @transform_8, window_bounds = array<i64: 128, 128>}, {pipeline_mode = #tpu.pipeline_mode<synchronous>, transform_indices = @transform_9, window_bounds = array<i64: 128, 128>}, {pipeline_mode = #tpu.pipeline_mode<synchronous>, transform_indices = @transform_10, window_bounds = array<i64: 128, 128>}, {transform_indices = @transform_11, window_bounds = array<i64: 1, 16, 128>}]} {
    %c0 = arith.constant 0 : index
    %c0_0 = arith.constant 0 : index
    %0 = vector.load %arg4[%c0, %c0_0] : memref<16x16xbf16, #tpu.memory_space<vmem>>, vector<16x16xbf16>
    %c0_1 = arith.constant 0 : index
    %c0_2 = arith.constant 0 : index
    %1 = vector.load %arg5[%c0_1, %c0_2] : memref<16x16xbf16, #tpu.memory_space<vmem>>, vector<16x16xbf16>
    %c0_3 = arith.constant 0 : index
    %c0_4 = arith.constant 0 : index
    %2 = vector.load %arg6[%c0_3, %c0_4] : memref<16x16xbf16, #tpu.memory_space<vmem>>, vector<16x16xbf16>
    %c0_5 = arith.constant 0 : index
    %c0_6 = arith.constant 0 : index
    %3 = vector.load %arg7[%c0_5, %c0_6] : memref<16x16xbf16, #tpu.memory_space<vmem>>, vector<16x16xbf16>
    %c0_7 = arith.constant 0 : index
    %c0_8 = arith.constant 0 : index
    %4 = vector.load %arg8[%c0_7, %c0_8] : memref<128x128xbf16, #tpu.memory_space<vmem>>, vector<128x128xbf16>
    %c0_9 = arith.constant 0 : index
    %c0_10 = arith.constant 0 : index
    %5 = vector.load %arg9[%c0_9, %c0_10] : memref<128x128xbf16, #tpu.memory_space<vmem>>, vector<128x128xbf16>
    %c0_11 = arith.constant 0 : index
    %c0_12 = arith.constant 0 : index
    %6 = vector.load %arg10[%c0_11, %c0_12] : memref<128x128xbf16, #tpu.memory_space<vmem>>, vector<128x128xbf16>
    %c0_13 = arith.constant 0 : index
    %c0_14 = arith.constant 0 : index
    %7 = vector.load %arg11[%c0_13, %c0_14] : memref<128x128xbf16, #tpu.memory_space<vmem>>, vector<128x128xbf16>
    %c0_15 = arith.constant 0 : index
    %c0_16 = arith.constant 0 : index
    %c0_17 = arith.constant 0 : index
    %8 = vector.load %arg1[%c0_15, %c0_16, %c0_17] : memref<1x16x128xf32, #tpu.memory_space<vmem>>, vector<1x16x128xf32>
    %9 = vector.shape_cast %8 : vector<1x16x128xf32> to vector<16x128xf32>
    %10 = arith.truncf %9 : vector<16x128xf32> to vector<16x128xbf16>
    %11 = arith.extf %10 : vector<16x128xbf16> to vector<16x128xf32>
    %12 = arith.subf %9, %11 : vector<16x128xf32>
    %13 = arith.truncf %12 : vector<16x128xf32> to vector<16x128xbf16>
    %cst = arith.constant dense<0.000000e+00> : vector<16x128xf32>
    %14 = tpu.matmul %0, %10, %cst {dimension_numbers = #tpu.dot_dimension_numbers<[1], [0], [0], [1], [0, 0, 1, 1], [], []>} : vector<16x16xbf16>, vector<16x128xbf16>, vector<16x128xf32> -> vector<16x128xf32>
    %cst_18 = arith.constant dense<0.000000e+00> : vector<16x128xf32>
    %15 = tpu.matmul %0, %13, %cst_18 {dimension_numbers = #tpu.dot_dimension_numbers<[1], [0], [0], [1], [0, 0, 1, 1], [], []>} : vector<16x16xbf16>, vector<16x128xbf16>, vector<16x128xf32> -> vector<16x128xf32>
    %16 = arith.addf %14, %15 : vector<16x128xf32>
    %cst_19 = arith.constant dense<0.000000e+00> : vector<16x128xf32>
    %17 = tpu.matmul %1, %10, %cst_19 {dimension_numbers = #tpu.dot_dimension_numbers<[1], [0], [0], [1], [0, 0, 1, 1], [], []>} : vector<16x16xbf16>, vector<16x128xbf16>, vector<16x128xf32> -> vector<16x128xf32>
    %18 = arith.addf %16, %17 : vector<16x128xf32>
    %cst_20 = arith.constant dense<0.000000e+00> : vector<16x128xf32>
    %19 = tpu.matmul %2, %10, %cst_20 {dimension_numbers = #tpu.dot_dimension_numbers<[1], [0], [0], [1], [0, 0, 1, 1], [], []>} : vector<16x16xbf16>, vector<16x128xbf16>, vector<16x128xf32> -> vector<16x128xf32>
    %cst_21 = arith.constant dense<0.000000e+00> : vector<16x128xf32>
    %20 = tpu.matmul %2, %13, %cst_21 {dimension_numbers = #tpu.dot_dimension_numbers<[1], [0], [0], [1], [0, 0, 1, 1], [], []>} : vector<16x16xbf16>, vector<16x128xbf16>, vector<16x128xf32> -> vector<16x128xf32>
    %21 = arith.addf %19, %20 : vector<16x128xf32>
    %cst_22 = arith.constant dense<0.000000e+00> : vector<16x128xf32>
    %22 = tpu.matmul %3, %10, %cst_22 {dimension_numbers = #tpu.dot_dimension_numbers<[1], [0], [0], [1], [0, 0, 1, 1], [], []>} : vector<16x16xbf16>, vector<16x128xbf16>, vector<16x128xf32> -> vector<16x128xf32>
    %23 = arith.addf %21, %22 : vector<16x128xf32>
    %cst_23 = arith.constant 0.000000e+00 : f32
    %24 = vector.broadcast %cst_23 : f32 to vector<16x128xf32>
    %25 = arith.subf %24, %23 : vector<16x128xf32>
    %26 = arith.truncf %18 : vector<16x128xf32> to vector<16x128xbf16>
    %27 = arith.extf %26 : vector<16x128xbf16> to vector<16x128xf32>
    %28 = arith.subf %18, %27 : vector<16x128xf32>
    %29 = arith.truncf %28 : vector<16x128xf32> to vector<16x128xbf16>
    %30 = arith.truncf %25 : vector<16x128xf32> to vector<16x128xbf16>
    %31 = arith.extf %30 : vector<16x128xbf16> to vector<16x128xf32>
    %32 = arith.subf %25, %31 : vector<16x128xf32>
    %33 = arith.truncf %32 : vector<16x128xf32> to vector<16x128xbf16>
    %cst_24 = arith.constant dense<0.000000e+00> : vector<16x128xf32>
    %34 = tpu.matmul %26, %4, %cst_24 {dimension_numbers = #tpu.dot_dimension_numbers<[1], [0], [0], [1], [0, 0, 1, 1], [], []>} : vector<16x128xbf16>, vector<128x128xbf16>, vector<16x128xf32> -> vector<16x128xf32>
    %cst_25 = arith.constant dense<0.000000e+00> : vector<16x128xf32>
    %35 = tpu.matmul %26, %5, %cst_25 {dimension_numbers = #tpu.dot_dimension_numbers<[1], [0], [0], [1], [0, 0, 1, 1], [], []>} : vector<16x128xbf16>, vector<128x128xbf16>, vector<16x128xf32> -> vector<16x128xf32>
    %36 = arith.addf %34, %35 : vector<16x128xf32>
    %cst_26 = arith.constant dense<0.000000e+00> : vector<16x128xf32>
    %37 = tpu.matmul %29, %4, %cst_26 {dimension_numbers = #tpu.dot_dimension_numbers<[1], [0], [0], [1], [0, 0, 1, 1], [], []>} : vector<16x128xbf16>, vector<128x128xbf16>, vector<16x128xf32> -> vector<16x128xf32>
    %38 = arith.addf %36, %37 : vector<16x128xf32>
    %cst_27 = arith.constant dense<0.000000e+00> : vector<16x128xf32>
    %39 = tpu.matmul %30, %6, %cst_27 {dimension_numbers = #tpu.dot_dimension_numbers<[1], [0], [0], [1], [0, 0, 1, 1], [], []>} : vector<16x128xbf16>, vector<128x128xbf16>, vector<16x128xf32> -> vector<16x128xf32>
    %cst_28 = arith.constant dense<0.000000e+00> : vector<16x128xf32>
    %40 = tpu.matmul %30, %7, %cst_28 {dimension_numbers = #tpu.dot_dimension_numbers<[1], [0], [0], [1], [0, 0, 1, 1], [], []>} : vector<16x128xbf16>, vector<128x128xbf16>, vector<16x128xf32> -> vector<16x128xf32>
    %41 = arith.addf %39, %40 : vector<16x128xf32>
    %cst_29 = arith.constant dense<0.000000e+00> : vector<16x128xf32>
    %42 = tpu.matmul %33, %6, %cst_29 {dimension_numbers = #tpu.dot_dimension_numbers<[1], [0], [0], [1], [0, 0, 1, 1], [], []>} : vector<16x128xbf16>, vector<128x128xbf16>, vector<16x128xf32> -> vector<16x128xf32>
    %43 = arith.addf %41, %42 : vector<16x128xf32>
    %44 = arith.addf %38, %43 : vector<16x128xf32>
    %cst_30 = arith.constant dense<0.000000e+00> : vector<16x128xf32>
    %45 = tpu.matmul %30, %4, %cst_30 {dimension_numbers = #tpu.dot_dimension_numbers<[1], [0], [0], [1], [0, 0, 1, 1], [], []>} : vector<16x128xbf16>, vector<128x128xbf16>, vector<16x128xf32> -> vector<16x128xf32>
    %cst_31 = arith.constant dense<0.000000e+00> : vector<16x128xf32>
    %46 = tpu.matmul %30, %5, %cst_31 {dimension_numbers = #tpu.dot_dimension_numbers<[1], [0], [0], [1], [0, 0, 1, 1], [], []>} : vector<16x128xbf16>, vector<128x128xbf16>, vector<16x128xf32> -> vector<16x128xf32>
    %47 = arith.addf %45, %46 : vector<16x128xf32>
    %cst_32 = arith.constant dense<0.000000e+00> : vector<16x128xf32>
    %48 = tpu.matmul %33, %4, %cst_32 {dimension_numbers = #tpu.dot_dimension_numbers<[1], [0], [0], [1], [0, 0, 1, 1], [], []>} : vector<16x128xbf16>, vector<128x128xbf16>, vector<16x128xf32> -> vector<16x128xf32>
    %49 = arith.addf %47, %48 : vector<16x128xf32>
    %cst_33 = arith.constant dense<0.000000e+00> : vector<16x128xf32>
    %50 = tpu.matmul %26, %6, %cst_33 {dimension_numbers = #tpu.dot_dimension_numbers<[1], [0], [0], [1], [0, 0, 1, 1], [], []>} : vector<16x128xbf16>, vector<128x128xbf16>, vector<16x128xf32> -> vector<16x128xf32>
    %cst_34 = arith.constant dense<0.000000e+00> : vector<16x128xf32>
    %51 = tpu.matmul %26, %7, %cst_34 {dimension_numbers = #tpu.dot_dimension_numbers<[1], [0], [0], [1], [0, 0, 1, 1], [], []>} : vector<16x128xbf16>, vector<128x128xbf16>, vector<16x128xf32> -> vector<16x128xf32>
    %52 = arith.addf %50, %51 : vector<16x128xf32>
    %cst_35 = arith.constant dense<0.000000e+00> : vector<16x128xf32>
    %53 = tpu.matmul %29, %6, %cst_35 {dimension_numbers = #tpu.dot_dimension_numbers<[1], [0], [0], [1], [0, 0, 1, 1], [], []>} : vector<16x128xbf16>, vector<128x128xbf16>, vector<16x128xf32> -> vector<16x128xf32>
    %54 = arith.addf %52, %53 : vector<16x128xf32>
    %55 = arith.subf %49, %54 : vector<16x128xf32>
    %c0_36 = arith.constant 0 : index
    %c0_37 = arith.constant 0 : index
    %c0_38 = arith.constant 0 : index
    %56 = vector.load %arg3[%c0_36, %c0_37, %c0_38] : memref<1x16x128xf32, #tpu.memory_space<vmem>>, vector<1x16x128xf32>
    %57 = vector.shape_cast %56 : vector<1x16x128xf32> to vector<16x128xf32>
    %cst_39 = arith.constant 1.000000e+00 : f32
    %58 = vector.broadcast %cst_39 : f32 to vector<16x128xf32>
    %59 = arith.subf %58, %57 : vector<16x128xf32>
    %60 = arith.mulf %59, %44 : vector<16x128xf32>
    %61 = arith.mulf %59, %55 : vector<16x128xf32>
    %62 = arith.truncf %60 : vector<16x128xf32> to vector<16x128xbf16>
    %63 = arith.extf %62 : vector<16x128xbf16> to vector<16x128xf32>
    %64 = arith.subf %60, %63 : vector<16x128xf32>
    %65 = arith.truncf %64 : vector<16x128xf32> to vector<16x128xbf16>
    %66 = arith.truncf %61 : vector<16x128xf32> to vector<16x128xbf16>
    %67 = arith.extf %66 : vector<16x128xbf16> to vector<16x128xf32>
    %68 = arith.subf %61, %67 : vector<16x128xf32>
    %69 = arith.truncf %68 : vector<16x128xf32> to vector<16x128xbf16>
    %cst_40 = arith.constant dense<0.000000e+00> : vector<16x128xf32>
    %70 = tpu.matmul %0, %62, %cst_40 {dimension_numbers = #tpu.dot_dimension_numbers<[1], [0], [0], [1], [0, 0, 1, 1], [], []>} : vector<16x16xbf16>, vector<16x128xbf16>, vector<16x128xf32> -> vector<16x128xf32>
    %cst_41 = arith.constant dense<0.000000e+00> : vector<16x128xf32>
    %71 = tpu.matmul %0, %65, %cst_41 {dimension_numbers = #tpu.dot_dimension_numbers<[1], [0], [0], [1], [0, 0, 1, 1], [], []>} : vector<16x16xbf16>, vector<16x128xbf16>, vector<16x128xf32> -> vector<16x128xf32>
    %72 = arith.addf %70, %71 : vector<16x128xf32>
    %cst_42 = arith.constant dense<0.000000e+00> : vector<16x128xf32>
    %73 = tpu.matmul %1, %62, %cst_42 {dimension_numbers = #tpu.dot_dimension_numbers<[1], [0], [0], [1], [0, 0, 1, 1], [], []>} : vector<16x16xbf16>, vector<16x128xbf16>, vector<16x128xf32> -> vector<16x128xf32>
    %74 = arith.addf %72, %73 : vector<16x128xf32>
    %cst_43 = arith.constant dense<0.000000e+00> : vector<16x128xf32>
    %75 = tpu.matmul %2, %66, %cst_43 {dimension_numbers = #tpu.dot_dimension_numbers<[1], [0], [0], [1], [0, 0, 1, 1], [], []>} : vector<16x16xbf16>, vector<16x128xbf16>, vector<16x128xf32> -> vector<16x128xf32>
    %cst_44 = arith.constant dense<0.000000e+00> : vector<16x128xf32>
    %76 = tpu.matmul %2, %69, %cst_44 {dimension_numbers = #tpu.dot_dimension_numbers<[1], [0], [0], [1], [0, 0, 1, 1], [], []>} : vector<16x16xbf16>, vector<16x128xbf16>, vector<16x128xf32> -> vector<16x128xf32>
    %77 = arith.addf %75, %76 : vector<16x128xf32>
    %cst_45 = arith.constant dense<0.000000e+00> : vector<16x128xf32>
    %78 = tpu.matmul %3, %66, %cst_45 {dimension_numbers = #tpu.dot_dimension_numbers<[1], [0], [0], [1], [0, 0, 1, 1], [], []>} : vector<16x16xbf16>, vector<16x128xbf16>, vector<16x128xf32> -> vector<16x128xf32>
    %79 = arith.addf %77, %78 : vector<16x128xf32>
    %80 = arith.subf %74, %79 : vector<16x128xf32>
    %cst_46 = arith.constant dense<0.000000e+00> : vector<16x128xf32>
    %81 = tpu.matmul %0, %66, %cst_46 {dimension_numbers = #tpu.dot_dimension_numbers<[1], [0], [0], [1], [0, 0, 1, 1], [], []>} : vector<16x16xbf16>, vector<16x128xbf16>, vector<16x128xf32> -> vector<16x128xf32>
    %cst_47 = arith.constant dense<0.000000e+00> : vector<16x128xf32>
    %82 = tpu.matmul %0, %69, %cst_47 {dimension_numbers = #tpu.dot_dimension_numbers<[1], [0], [0], [1], [0, 0, 1, 1], [], []>} : vector<16x16xbf16>, vector<16x128xbf16>, vector<16x128xf32> -> vector<16x128xf32>
    %83 = arith.addf %81, %82 : vector<16x128xf32>
    %cst_48 = arith.constant dense<0.000000e+00> : vector<16x128xf32>
    %84 = tpu.matmul %1, %66, %cst_48 {dimension_numbers = #tpu.dot_dimension_numbers<[1], [0], [0], [1], [0, 0, 1, 1], [], []>} : vector<16x16xbf16>, vector<16x128xbf16>, vector<16x128xf32> -> vector<16x128xf32>
    %85 = arith.addf %83, %84 : vector<16x128xf32>
    %cst_49 = arith.constant dense<0.000000e+00> : vector<16x128xf32>
    %86 = tpu.matmul %2, %62, %cst_49 {dimension_numbers = #tpu.dot_dimension_numbers<[1], [0], [0], [1], [0, 0, 1, 1], [], []>} : vector<16x16xbf16>, vector<16x128xbf16>, vector<16x128xf32> -> vector<16x128xf32>
    %cst_50 = arith.constant dense<0.000000e+00> : vector<16x128xf32>
    %87 = tpu.matmul %2, %65, %cst_50 {dimension_numbers = #tpu.dot_dimension_numbers<[1], [0], [0], [1], [0, 0, 1, 1], [], []>} : vector<16x16xbf16>, vector<16x128xbf16>, vector<16x128xf32> -> vector<16x128xf32>
    %88 = arith.addf %86, %87 : vector<16x128xf32>
    %cst_51 = arith.constant dense<0.000000e+00> : vector<16x128xf32>
    %89 = tpu.matmul %3, %62, %cst_51 {dimension_numbers = #tpu.dot_dimension_numbers<[1], [0], [0], [1], [0, 0, 1, 1], [], []>} : vector<16x16xbf16>, vector<16x128xbf16>, vector<16x128xf32> -> vector<16x128xf32>
    %90 = arith.addf %88, %89 : vector<16x128xf32>
    %91 = arith.addf %85, %90 : vector<16x128xf32>
    %92 = arith.truncf %80 : vector<16x128xf32> to vector<16x128xbf16>
    %93 = arith.extf %92 : vector<16x128xbf16> to vector<16x128xf32>
    %94 = arith.subf %80, %93 : vector<16x128xf32>
    %95 = arith.truncf %94 : vector<16x128xf32> to vector<16x128xbf16>
    %96 = arith.truncf %91 : vector<16x128xf32> to vector<16x128xbf16>
    %97 = arith.extf %96 : vector<16x128xbf16> to vector<16x128xf32>
    %98 = arith.subf %91, %97 : vector<16x128xf32>
    %99 = arith.truncf %98 : vector<16x128xf32> to vector<16x128xbf16>
    %cst_52 = arith.constant dense<0.000000e+00> : vector<16x128xf32>
    %100 = tpu.matmul %92, %4, %cst_52 {dimension_numbers = #tpu.dot_dimension_numbers<[1], [0], [0], [1], [0, 0, 1, 1], [], []>} : vector<16x128xbf16>, vector<128x128xbf16>, vector<16x128xf32> -> vector<16x128xf32>
    %cst_53 = arith.constant dense<0.000000e+00> : vector<16x128xf32>
    %101 = tpu.matmul %92, %5, %cst_53 {dimension_numbers = #tpu.dot_dimension_numbers<[1], [0], [0], [1], [0, 0, 1, 1], [], []>} : vector<16x128xbf16>, vector<128x128xbf16>, vector<16x128xf32> -> vector<16x128xf32>
    %102 = arith.addf %100, %101 : vector<16x128xf32>
    %cst_54 = arith.constant dense<0.000000e+00> : vector<16x128xf32>
    %103 = tpu.matmul %95, %4, %cst_54 {dimension_numbers = #tpu.dot_dimension_numbers<[1], [0], [0], [1], [0, 0, 1, 1], [], []>} : vector<16x128xbf16>, vector<128x128xbf16>, vector<16x128xf32> -> vector<16x128xf32>
    %104 = arith.addf %102, %103 : vector<16x128xf32>
    %cst_55 = arith.constant dense<0.000000e+00> : vector<16x128xf32>
    %105 = tpu.matmul %96, %6, %cst_55 {dimension_numbers = #tpu.dot_dimension_numbers<[1], [0], [0], [1], [0, 0, 1, 1], [], []>} : vector<16x128xbf16>, vector<128x128xbf16>, vector<16x128xf32> -> vector<16x128xf32>
    %cst_56 = arith.constant dense<0.000000e+00> : vector<16x128xf32>
    %106 = tpu.matmul %96, %7, %cst_56 {dimension_numbers = #tpu.dot_dimension_numbers<[1], [0], [0], [1], [0, 0, 1, 1], [], []>} : vector<16x128xbf16>, vector<128x128xbf16>, vector<16x128xf32> -> vector<16x128xf32>
    %107 = arith.addf %105, %106 : vector<16x128xf32>
    %cst_57 = arith.constant dense<0.000000e+00> : vector<16x128xf32>
    %108 = tpu.matmul %99, %6, %cst_57 {dimension_numbers = #tpu.dot_dimension_numbers<[1], [0], [0], [1], [0, 0, 1, 1], [], []>} : vector<16x128xbf16>, vector<128x128xbf16>, vector<16x128xf32> -> vector<16x128xf32>
    %109 = arith.addf %107, %108 : vector<16x128xf32>
    %110 = arith.subf %104, %109 : vector<16x128xf32>
    %cst_58 = arith.constant 3.906250e-03 : f32
    %111 = vector.broadcast %cst_58 : f32 to vector<16x128xf32>
    %112 = arith.mulf %110, %111 : vector<16x128xf32>
    %c0_59 = arith.constant 0 : index
    %c0_60 = arith.constant 0 : index
    %c0_61 = arith.constant 0 : index
    %113 = vector.load %arg2[%c0_59, %c0_60, %c0_61] : memref<1x16x128xf32, #tpu.memory_space<vmem>>, vector<1x16x128xf32>
    %114 = vector.shape_cast %113 : vector<1x16x128xf32> to vector<16x128xf32>
    %115 = arith.addf %114, %112 : vector<16x128xf32>
    %c0_62 = arith.constant 0 : index
    %c0_63 = arith.constant 0 : index
    %c0_64 = arith.constant 0 : index
    %116 = vector.load %arg12[%c0_62, %c0_63, %c0_64] : memref<1x16x128xf32, #tpu.memory_space<vmem>>, vector<1x16x128xf32>
    %117 = vector.shape_cast %116 : vector<1x16x128xf32> to vector<16x128xf32>
    %118 = vector.shape_cast %115 : vector<16x128xf32> to vector<1x16x128xf32>
    tpu.vector_store %arg12[%c0_62, %c0_63, %c0_64], %118 {strides = array<i32>} : memref<1x16x128xf32, #tpu.memory_space<vmem>>, vector<1x16x128xf32>,
    return
  }
  func.func @transform_0(%arg0: i32) -> (i32, i32, i32) {
    %c0_i32 = arith.constant 0 : i32
    %c0_i32_0 = arith.constant 0 : i32
    %c0_i32_1 = arith.constant 0 : i32
    return %arg0, %c0_i32, %c0_i32_0 : i32, i32, i32
  }
  func.func @transform_1(%arg0: i32) -> (i32, i32, i32) {
    %c0_i32 = arith.constant 0 : i32
    %c0_i32_0 = arith.constant 0 : i32
    %c0_i32_1 = arith.constant 0 : i32
    return %arg0, %c0_i32, %c0_i32_0 : i32, i32, i32
  }
  func.func @transform_2(%arg0: i32) -> (i32, i32, i32) {
    %c0_i32 = arith.constant 0 : i32
    %c0_i32_0 = arith.constant 0 : i32
    %c0_i32_1 = arith.constant 0 : i32
    return %arg0, %c0_i32, %c0_i32_0 : i32, i32, i32
  }
  func.func @transform_3(%arg0: i32) -> (i32, i32) {
    %c0_i32 = arith.constant 0 : i32
    %c0_i32_0 = arith.constant 0 : i32
    %c0_i32_1 = arith.constant 0 : i32
    return %c0_i32, %c0_i32_0 : i32, i32
  }
  func.func @transform_4(%arg0: i32) -> (i32, i32) {
    %c0_i32 = arith.constant 0 : i32
    %c0_i32_0 = arith.constant 0 : i32
    %c0_i32_1 = arith.constant 0 : i32
    return %c0_i32, %c0_i32_0 : i32, i32
  }
  func.func @transform_5(%arg0: i32) -> (i32, i32) {
    %c0_i32 = arith.constant 0 : i32
    %c0_i32_0 = arith.constant 0 : i32
    %c0_i32_1 = arith.constant 0 : i32
    return %c0_i32, %c0_i32_0 : i32, i32
  }
  func.func @transform_6(%arg0: i32) -> (i32, i32) {
    %c0_i32 = arith.constant 0 : i32
    %c0_i32_0 = arith.constant 0 : i32
    %c0_i32_1 = arith.constant 0 : i32
    return %c0_i32, %c0_i32_0 : i32, i32
  }
  func.func @transform_7(%arg0: i32) -> (i32, i32) {
    %c0_i32 = arith.constant 0 : i32
    %c0_i32_0 = arith.constant 0 : i32
    %c0_i32_1 = arith.constant 0 : i32
    return %c0_i32, %c0_i32_0 : i32, i32
  }
  func.func @transform_8(%arg0: i32) -> (i32, i32) {
    %c0_i32 = arith.constant 0 : i32
    %c0_i32_0 = arith.constant 0 : i32
    %c0_i32_1 = arith.constant 0 : i32
    return %c0_i32, %c0_i32_0 : i32, i32
  }
  func.func @transform_9(%arg0: i32) -> (i32, i32) {
    %c0_i32 = arith.constant 0 : i32
    %c0_i32_0 = arith.constant 0 : i32
    %c0_i32_1 = arith.constant 0 : i32
    return %c0_i32, %c0_i32_0 : i32, i32
  }
  func.func @transform_10(%arg0: i32) -> (i32, i32) {
    %c0_i32 = arith.constant 0 : i32
    %c0_i32_0 = arith.constant 0 : i32
    %c0_i32_1 = arith.constant 0 : i32
    return %c0_i32, %c0_i32_0 : i32, i32
  }
  func.func @transform_11(%arg0: i32) -> (i32, i32, i32) {
    %c0_i32 = arith.constant 0 : i32
    %c0_i32_0 = arith.constant 0 : i32
    %c0_i32_1 = arith.constant 0 : i32
    return %arg0, %c0_i32, %c0_i32_0 : i32, i32, i32
  }
}

</mosaic_0001>

<bundles_post_ra>
// kernel: tpu_custom_call.1
= control target key start
LH: loop header
LB: loop body
LE: loop exit
PB: predicated region body
PF: predicated region fallthrough
CT: control target
= control target key end

     0   :  { %s4932_s0 = inlined_call_operand.hbm [shape: f32[2,16,128], index: 0, kind: input, shape index: {}]   ;;  %s4933_s1 = inlined_call_operand.hbm [shape: f32[2,16,128], index: 1, kind: input, shape index: {}]   ;;  %s4934_s2 = inlined_call_operand.hbm [shape: f32[2,16,128], index: 2, kind: input, shape index: {}]   ;;  %s4935_s3 = inlined_call_operand.hbm [shape: bf16[16,16], index: 3, kind: input, shape index: {}]   ;;  %s4936_s4 = inlined_call_operand.hbm [shape: bf16[16,16], index: 4, kind: input, shape index: {}]   ;;  %s4937_s5 = inlined_call_operand.vmem [shape: bf16[16,16], index: 5, kind: input, shape index: {}]   ;;  %s4938_s6 = inlined_call_operand.hbm [shape: bf16[16,16], index: 6, kind: input, shape index: {}]   ;;  %s4939_s7 = inlined_call_operand.hbm [shape: bf16[128,128], index: 7, kind: input, shape index: {}]   ;;  %s4940_s8 = inlined_call_operand.hbm [shape: bf16[128,128], index: 8, kind: input, shape index: {}]   ;;  %s4941_s9 = inlined_call_operand.hbm [shape: bf16[128,128], index: 9, kind: input, shape index: {}]   ;;  %s4942_s10 = inlined_call_operand.hbm [shape: bf16[128,128], index: 10, kind: input, shape index: {}]   ;;  %s4943_s11 = inlined_call_operand.hbm [shape: f32[2,16,128], index: 11, kind: output, shape index: {}]  }
   0x1   :  { %4975 = sst [smem:[#allocation35_spill]] %s4933_s1 }
   0x2   :  { %4976 = sst [smem:[#allocation36_spill]] %s4935_s3 }
   0x3   :  { %4977 = sst [smem:[#allocation37_spill]] %s4938_s6 }
   0x4   :  { %4978 = sst [smem:[#allocation38_spill]] %s4940_s8 }
   0x5   :  { %4979 = sst [smem:[#allocation39_spill]] %s4943_s11 }
   0x6   :  { %16 = vsyncpa [#allocation3], 0 }
   0x7   :  { %18 = vsyncpa [#allocation3 + $0x1], 0 }
   0x8   :  { %19 = vsyncpa [#allocation6], 0 }
   0x9   :  { %21 = vsyncpa [#allocation6 + $0x1], 0 }
   0xa   :  { %22 = vsyncpa [#allocation9], 0 }
   0xb   :  { %23 = vsyncpa [#allocation12], 0 }
   0xc   :  { %24 = vsyncpa [#allocation15], 0 }
   0xd   :  { %25 = vsyncpa [#allocation18], 0 }
   0xe   :  { %26 = vsyncpa [#allocation4], 0 }
   0xf   :  { %28 = vsyncpa [#allocation4 + $0x1], 0  ;;  %s4022_s17 = smov 0   ;;  %s4024_s18 = smov 0  }
  0x10   :  { %s4026_s19 = smov 0   ;;  %s4028_s20 = smov 0  }
  0x11 LB: > { %4980 = sst [smem:[#allocation27_spill]] %s3929_s17  ;;  %s3943_s21 = smov [#allocation8]   ;;  %s3941_s20 = sphi %s4028_s20, %s5029_s20   ;;  %s3937_s19 = sphi %s4026_s19, %s5033_s19   ;;  %s3933_s18 = sphi %s4024_s18, %s5032_s18   ;;  %s3929_s17 = sphi %s4022_s17, %s5031_s17  }
  0x12   : > { %4981 = sst [smem:[#allocation28_spill]] %s3941_s20  ;;  %s323_s22 = sshll.u32 %s3943_s21, 4  ;;  %s324_s22 = int_to_ptr.vmem [resolvable:$true] %s323_s22 }
  0x13   : > { %s4043_s23 = sadd.s32 4294967295, %s3941_s20   ;;  %p2652_p0 = scmp.ge.s32.totalorder %s3941_s20, 1 }
  0x14   : > { %p4955_p1 = scmp.eq.s32.totalorder %s4043_s23, 0  ;;  %p311_p2 = scmp.lt.s32.totalorder %s3941_s20, 3 }
  0x15   : > { %s3944_s25 = smov [#allocation11]   ;;  %s3945_s28 = smov [#allocation14]  }
  0x16   : > { %p4048_p3 = pnand %p2652_p0, %p311_p2  ;;  %s352_s26 = sshll.u32 %s3944_s25, 4  ;;  %s4061_s26 = int_to_ptr.vmem [resolvable:$true] %s352_s26 }
  0x17   : > { %s378_s29 = sshll.u32 %s3945_s28, 4  ;;  %s3602_s12 = scalar_lea.vmem %s324_s22, 128  ;;  %s4063_s29 = int_to_ptr.vmem [resolvable:$true] %s378_s29 }
  0x18   : > { %s4982_s24 = scalar_select %p4048_p3, 1, 0 }
  0x19   : > { %p3447_p5 = pneg %p4048_p3  ;;  %p3603_p8 = scmp.ne.s32.totalorder %s324_s22, %s3602_s12 }
  0x1a   : > { %p3610_p11 = scmp.lt.s32.totalorder %s324_s22, %s324_s22  ;;  %p3611_p12 = scmp.lt.s32.totalorder %s3602_s12, %s3602_s12 }
  0x1b   : > { %p4057_p6 = pnand %p3447_p5, %p4955_p1 }
  0x1c   : > { %p3612_p13 = por %p3611_p12, %p3610_p11 }
  0x1d   : > { %s4983_s27 = scalar_select %p4057_p6, 1, 0 }
  0x1e   : > { %p4067_p7 = pneg %p4057_p6 }
  0x20   : > { %s4984_s30 = scalar_select %p4067_p7, 1, 0 }
  0x21   : > { %p3605_p9 = pnand %p3603_p8, %p4067_p7 }
  0x23   : > { %p3606_p10 = pneg %p3605_p9 }
  0x25   : > { %p3613_p0 = pnand %p3612_p13, %p3606_p10 }
  0x27   : > { %3616 = shalt.err (!%p3613_p0)
}
  0x28   : > { %s4945_s13 = smov 64   ;;  %s4947_s14 = smov 4  }
  0x29   : > { %s4985_s3 = sld [smem:[#allocation36_spill]]  ;;  %s3628_s21 = scalar_lea.vmem %s4061_s26, 128 }
  0x2a   : > { %p3629_p2 = scmp.ne.s32.totalorder %s4061_s26, %s3628_s21  ;;  %p3636_p9 = scmp.lt.s32.totalorder %s4061_s26, %s4061_s26 }
  0x2b   : > { %p3637_p10 = scmp.lt.s32.totalorder %s3628_s21, %s3628_s21 }
  0x2c   : > { %p3631_p5 = pnand %p3629_p2, %p4067_p7 }
  0x2d   : > { %p3638_p11 = por %p3637_p10, %p3636_p9 }
  0x2e   : > { %p3632_p8 = pneg %p3631_p5 }
  0x2f   : > { %3450 = dma.hbm_to_vmem [thread:$0]  (!%p4057_p6), %s4985_s3, 128, %s324_s22, [#allocation9], %s4945_s13, %s4945_s13, %s4947_s14  }
  0x30   : > { %p3639_p12 = pnand %p3638_p11, %p3632_p8 }
  0x32   : > { %3642 = shalt.err (!%p3639_p12)
}
  0x33   : > { %s4986_s6 = sld [smem:[#allocation37_spill]]  ;;  %s3654_s22 = scalar_lea.vmem %s4063_s29, 1024 }
  0x34   : > { %p3655_p13 = scmp.ne.s32.totalorder %s4063_s29, %s3654_s22  ;;  %p3662_p5 = scmp.lt.s32.totalorder %s4063_s29, %s4063_s29 }
  0x35   : > { %p3663_p8 = scmp.lt.s32.totalorder %s3654_s22, %s3654_s22 }
  0x36   : > { %p3657_p0 = pnand %p3655_p13, %p4067_p7 }
  0x37   : > { %p3664_p9 = por %p3663_p8, %p3662_p5 }
  0x38   : > { %p3658_p2 = pneg %p3657_p0 }
  0x39   : > { %3456 = dma.hbm_to_vmem [thread:$0]  (!%p4057_p6), %s4986_s6, 128, %s4061_s26, [#allocation12], %s4945_s13, %s4945_s13, %s4947_s14  }
  0x3a   : > { %p3665_p10 = pnand %p3664_p9, %p3658_p2 }
  0x3c   : > { %3668 = shalt.err (!%p3665_p10)
}
  0x3d   : > { %s4987_s8 = sld [smem:[#allocation38_spill]]  ;;  %s2651_s26 = sadd.s32 4294967294, %s3941_s20  }
  0x3e   : > { %s4113_s16 = sadd.s32 1, %s3941_s20   ;;  %s41_s21 = sadd.s32 1, %s3937_s19 }
  0x3f   : > { %4988 = sst [smem:[#allocation29_spill]] %s4113_s16  ;;  %s38_s25 = ssub.s32 %s3941_s20, %s4113_s16 }
  0x40   : > { %p48_p11 = scmp.ne.s32.totalorder %s3937_s19, %s3933_s18  ;;  %p39_p12 = scmp.eq.s32.totalorder %s38_s25, 0 }
  0x41   : > { %p49_p13 = scmp.eq.s32.totalorder %s3941_s20, 0  ;;  %p54_p0 = scmp.ne.s32.totalorder %s3933_s18, %s3929_s17 }
  0x42   : > { %p298_p2 = scmp.eq.s32.totalorder %s4043_s23, 1  ;;  %p304_p10 = scmp.eq.s32.totalorder %s2651_s26, 1 }
  0x43   : > { %3462 = dma.hbm_to_vmem [thread:$0]  (!%p4057_p6), %s4987_s8, 1024, %s4063_s29, [#allocation15], %s4945_s13, %s4945_s13, %s4947_s14  }
  0x44   : > { %s4125_s28 = scalar_select %p39_p12, %s3937_s19, %s41_s21  }
  0x45   : > { %p50_p5 = por %p49_p13, %p48_p11  ;;  %p4129_p8 = por %p4955_p1, %p54_p0 }
  0x46   : > { %4989 = sst [smem:[#allocation30_spill]] %s4125_s28  ;;  %p4133_p9 = por %p298_p2, %p48_p11 }
  0x47   : > { %s4990_s29 = scalar_select %p4129_p8, 1, 0 }
  0x48   : > { %s4991_s22 = scalar_select %p4133_p9, 1, 0 }
  0x49   : > { %p3490_p4 = scmp.lt.s32.totalorder %s3941_s20, 2  ;;  %s4949_s12 = sand.u32 1, %s3937_s19  }
  0x4a   : > { %p4139_p3 = por %p304_p10, %p54_p0  ;;  %s4145_s21 = sshll.u32 %s4949_s12, 4 }
  0x4b   : > { %s4148_s25 = sshll.u32 %s3941_s20, 8  ;;  %p4150_p12 = pnand %p3490_p4, %p50_p5 }
  0x4c   : > { %s4992_s15 = scalar_select %p4139_p3, 1, 0 }
  0x4d   : > { %s439_s14 = sand.u32 1, %s3941_s20   ;;  %s4995_s1 = sld [smem:[#allocation35_spill]] }
  0x4e   : > { %4993 = sst [smem:[#allocation31_spill]] %s4992_s15  ;;  %s443_s12 = scalar_lea.vmem [#allocation5], %s4145_s21 }
  0x4f   : > { %s450_s8 = sshll.u32 %s443_s12, 4  ;;  %s4164_s28 = scalar_lea.sflag [#allocation6], %s439_s14  ;;  %s4162_s8 = int_to_ptr.vmem [resolvable:$true] %s450_s8 }
  0x50   : > { %p4170_p11 = pneg %p4150_p12 }
  0x53   : > { %s4159_s6 = scalar_lea.hbm %s4995_s1, %s4148_s25  ;;  %s3674_s20 = scalar_lea.hbm %s4995_s1, 512 }
  0x54   : > { %s3669_s16 = scalar_lea.hbm %s4159_s6, 256  ;;  %p3675_p2 = scmp.lt.s32.totalorder %s4159_s6, %s4995_s1 }
  0x55   : > { %p3670_p4 = scmp.ne.s32.totalorder %s4159_s6, %s3669_s16  ;;  %p3676_p5 = scmp.lt.s32.totalorder %s3674_s20, %s3669_s16 }
  0x57   : > { %p3672_p13 = pnand %p4170_p11, %p3670_p4  ;;  %p3677_p10 = por %p3676_p5, %p3675_p2 }
  0x59   : > { %p3673_p0 = pneg %p3672_p13 }
  0x5b   : > { %p3678_p1 = pnand %p3677_p10, %p3673_p0 }
  0x5d   : > { %3681 = shalt.err (!%p3678_p1)
}
  0x5e   : > { %s3682_s14 = scalar_lea.vmem %s4162_s8, 256  ;;  %s3948_s11 = smov [#allocation5]  }
  0x5f   : > { %p3683_p3 = scmp.ne.s32.totalorder %s4162_s8, %s3682_s14  ;;  %s3687_s3 = sshll.u32 %s3948_s11, 4  ;;  %s3688_s3 = int_to_ptr.vmem [resolvable:$false] %s3687_s3 }
  0x60   : > { %s3689_s26 = scalar_lea.vmem %s3688_s3, 512  ;;  %p3690_p9 = scmp.lt.s32.totalorder %s4162_s8, %s3688_s3 }
  0x61   : > { %p3685_p4 = pnand %p3683_p3, %p4170_p11  ;;  %p3691_p8 = scmp.lt.s32.totalorder %s3689_s26, %s3682_s14 }
  0x63   : > { %p3686_p13 = pneg %p3685_p4  ;;  %p3692_p6 = por %p3691_p8, %p3690_p9 }
  0x65   : > { %p3693_p7 = pnand %p3692_p6, %p3686_p13 }
  0x67   : > { %3696 = shalt.err (!%p3693_p7)
}
  0x68   : > { %s4963_s17 = smov 128   ;;  %s4965_s20 = smov 8  }
  0x69   : > { %3475 = dma.hbm_to_vmem [thread:$0]  (!%p4150_p12), %s4159_s6, 256, %s4162_s8, %s4164_s28, %s4963_s17, %s4963_s17, %s4965_s20  }
  0x6a   : > { %s3951_s11 = smov [#allocation10]   ;;  %s3952_s12 = smov [#allocation13]  }
  0x6b   : > { %s336_s16 = sshll.u32 %s3951_s11, 4  ;;  %s365_s14 = sshll.u32 %s3952_s12, 4  ;;  %s337_s16 = int_to_ptr.vmem [resolvable:$true] %s336_s16  ;;  %s366_s14 = int_to_ptr.vmem [resolvable:$true] %s365_s14 }
  0x6c   : > { %s3708_s3 = scalar_lea.vmem %s337_s16, 128  ;;  %p4997_p3 = scmp.ne.s32.totalorder %s4984_s30, 0 }
  0x6d   : > { %p3709_p1 = scmp.ne.s32.totalorder %s337_s16, %s3708_s3  ;;  %p3716_p8 = scmp.lt.s32.totalorder %s337_s16, %s337_s16 }
  0x6e   : > { %p3717_p9 = scmp.lt.s32.totalorder %s3708_s3, %s3708_s3 }
  0x6f   : > { %p3711_p6 = pnand %p3709_p1, %p4997_p3 }
  0x70   : > { %p3718_p0 = por %p3717_p9, %p3716_p8 }
  0x71   : > { %p3712_p7 = pneg %p3711_p6 }
  0x73   : > { %p3719_p2 = pnand %p3718_p0, %p3712_p7 }
  0x75   : > { %3722 = shalt.err (!%p3719_p2)
}
  0x76   : > { %p4998_p5 = scmp.ne.s32.totalorder %s4983_s27, 0  ;;  %s4999_s26 = smov 4  }
  0x77   : > { %s5000_s1 = smov 64   ;;  %s3734_s11 = scalar_lea.vmem %s366_s14, 1024 }
  0x78   : > { %3453 = dma.hbm_to_vmem [thread:$0]  (!%p4998_p5), %s4936_s4, 128, %s337_s16, [#allocation9], %s5000_s1, %s5000_s1, %s4999_s26  }
  0x79   : > { %p3735_p10 = scmp.ne.s32.totalorder %s366_s14, %s3734_s11  ;;  %p3742_p1 = scmp.lt.s32.totalorder %s366_s14, %s366_s14 }
  0x7a   : > { %p3743_p6 = scmp.lt.s32.totalorder %s3734_s11, %s3734_s11 }
  0x7b   : > { %p3737_p4 = pnand %p3735_p10, %p4997_p3 }
  0x7c   : > { %p3744_p7 = por %p3743_p6, %p3742_p1 }
  0x7d   : > { %p3738_p13 = pneg %p3737_p4 }
  0x7f   : > { %p3745_p8 = pnand %p3744_p7, %p3738_p13 }
  0x81   : > { %3748 = shalt.err (!%p3745_p8)
}
  0x82   : > { %3459 = dma.hbm_to_vmem [thread:$0]  (!%p4998_p5), %s4939_s7, 1024, %s366_s14, [#allocation12], %s5000_s1, %s5000_s1, %s4999_s26  }
  0x83   : > { %s3953_s16 = smov [#allocation16]   ;;  %s3954_s8 = smov [#allocation17]  }
  0x84   : > { %s391_s6 = sshll.u32 %s3953_s16, 4  ;;  %s404_s17 = sshll.u32 %s3954_s8, 4  ;;  %s392_s6 = int_to_ptr.vmem [resolvable:$true] %s391_s6  ;;  %s405_s17 = int_to_ptr.vmem [resolvable:$true] %s404_s17 }
  0x85   : > { %s3760_s20 = scalar_lea.vmem %s392_s6, 1024  ;;  %p3768_p10 = scmp.lt.s32.totalorder %s392_s6, %s392_s6 }
  0x86   : > { %p3761_p9 = scmp.ne.s32.totalorder %s392_s6, %s3760_s20  ;;  %p3769_p4 = scmp.lt.s32.totalorder %s3760_s20, %s3760_s20 }
  0x88   : > { %p3763_p0 = pnand %p3761_p9, %p4997_p3  ;;  %p3770_p13 = por %p3769_p4, %p3768_p10 }
  0x8a   : > { %p3764_p2 = pneg %p3763_p0 }
  0x8c   : > { %p3771_p1 = pnand %p3770_p13, %p3764_p2 }
  0x8e   : > { %3774 = shalt.err (!%p3771_p1)
}
  0x8f   : > { %3465 = dma.hbm_to_vmem [thread:$0]  (!%p4998_p5), %s4941_s9, 1024, %s392_s6, [#allocation15], %s5000_s1, %s5000_s1, %s4999_s26  }
  0x90   : > { %s3786_s12 = scalar_lea.vmem %s405_s17, 1024  ;;  %p3794_p9 = scmp.lt.s32.totalorder %s405_s17, %s405_s17 }
  0x91   : > { %p3787_p6 = scmp.ne.s32.totalorder %s405_s17, %s3786_s12  ;;  %p3795_p0 = scmp.lt.s32.totalorder %s3786_s12, %s3786_s12 }
  0x93   : > { %p3789_p7 = pnand %p3787_p6, %p4997_p3  ;;  %p3796_p2 = por %p3795_p0, %p3794_p9 }
  0x95   : > { %p3790_p8 = pneg %p3789_p7 }
  0x97   : > { %p3797_p10 = pnand %p3796_p2, %p3790_p8 }
  0x99   : > { %3800 = shalt.err (!%p3797_p10)
}
  0x9a   : > { %3468 = dma.hbm_to_vmem [thread:$0]  (!%p4998_p5), %s4942_s10, 1024, %s405_s17, [#allocation18], %s5000_s1, %s5000_s1, %s4999_s26  }
  0x9b   : > { %s4240_s6 = scalar_lea.hbm %s4932_s0, %s4148_s25  ;;  %s422_s27 = scalar_lea.vmem [#allocation2], %s4145_s21 }
  0x9c   : > { %s429_s8 = sshll.u32 %s422_s27, 4  ;;  %s4249_s12 = scalar_lea.hbm %s4934_s2, %s4148_s25  ;;  %s4243_s8 = int_to_ptr.vmem [resolvable:$true] %s429_s8 }
  0x9d   : > { %s5001_s20 = sand.u32 1, %s3937_s19   ;;  %s3801_s1 = scalar_lea.hbm %s4240_s6, 256 }
  0x9e   : > { %s419_s3 = scalar_lea.sflag [#allocation3], %s5001_s20  ;;  %p3802_p3 = scmp.ne.s32.totalorder %s4240_s6, %s3801_s1 }
  0x9f   : > { %s3806_s30 = scalar_lea.hbm %s4932_s0, 512  ;;  %p3807_p13 = scmp.lt.s32.totalorder %s4240_s6, %s4932_s0 }
  0xa0   : > { %p3804_p5 = pnand %p3802_p3, %p4170_p11  ;;  %p3808_p1 = scmp.lt.s32.totalorder %s3806_s30, %s3801_s1 }
  0xa2   : > { %p3805_p4 = pneg %p3804_p5  ;;  %p3809_p6 = por %p3808_p1, %p3807_p13 }
  0xa4   : > { %p3810_p7 = pnand %p3809_p6, %p3805_p4 }
  0xa6   : > { %3813 = shalt.err (!%p3810_p7)
}
  0xa7   : > { %s3814_s25 = scalar_lea.vmem %s4243_s8, 256  ;;  %s3955_s14 = smov [#allocation2]  }
  0xa8   : > { %p3815_p8 = scmp.ne.s32.totalorder %s4243_s8, %s3814_s25  ;;  %s3819_s11 = sshll.u32 %s3955_s14, 4  ;;  %s3820_s11 = int_to_ptr.vmem [resolvable:$false] %s3819_s11 }
  0xa9   : > { %s3821_s20 = scalar_lea.vmem %s3820_s11, 512  ;;  %p3822_p2 = scmp.lt.s32.totalorder %s4243_s8, %s3820_s11 }
  0xaa   : > { %p3817_p9 = pnand %p3815_p8, %p4170_p11  ;;  %p3823_p10 = scmp.lt.s32.totalorder %s3821_s20, %s3814_s25 }
  0xac   : > { %p3818_p0 = pneg %p3817_p9  ;;  %p3824_p3 = por %p3823_p10, %p3822_p2 }
  0xae   : > { %p3825_p5 = pnand %p3824_p3, %p3818_p0 }
  0xb0   : > { %3828 = shalt.err (!%p3825_p5)
}
  0xb1   : > { %s5002_s1 = smov 8   ;;  %s5003_s17 = smov 128  }
  0xb2   : > { %3472 = dma.hbm_to_vmem [thread:$0]  (!%p4150_p12), %s4240_s6, 256, %s4243_s8, %s419_s3, %s5003_s17, %s5003_s17, %s5002_s1  }
  0xb3   : > { %s464_s26 = scalar_lea.vmem [#allocation7], %s4145_s21  ;;  %s3829_s16 = scalar_lea.hbm %s4249_s12, 256 }
  0xb4   : > { %s471_s30 = sshll.u32 %s464_s26, 4  ;;  %p3830_p4 = scmp.ne.s32.totalorder %s4249_s12, %s3829_s16  ;;  %s472_s30 = int_to_ptr.vmem [resolvable:$true] %s471_s30 }
  0xb5   : > { %s3834_s14 = scalar_lea.hbm %s4934_s2, 512  ;;  %p3835_p6 = scmp.lt.s32.totalorder %s4249_s12, %s4934_s2 }
  0xb6   : > { %p3832_p13 = pnand %p3830_p4, %p4170_p11  ;;  %p3836_p7 = scmp.lt.s32.totalorder %s3834_s14, %s3829_s16 }
  0xb8   : > { %p3833_p1 = pneg %p3832_p13  ;;  %p3837_p8 = por %p3836_p7, %p3835_p6 }
  0xba   : > { %p3838_p9 = pnand %p3837_p8, %p3833_p1 }
  0xbc   : > { %3841 = shalt.err (!%p3838_p9)
}
  0xbd   : > { %s3842_s21 = scalar_lea.vmem %s472_s30, 256  ;;  %s3956_s6 = smov [#allocation7]  }
  0xbe   : > { %p3843_p0 = scmp.ne.s32.totalorder %s472_s30, %s3842_s21  ;;  %s3847_s8 = sshll.u32 %s3956_s6, 4  ;;  %s3848_s8 = int_to_ptr.vmem [resolvable:$false] %s3847_s8 }
  0xbf   : > { %s3849_s3 = scalar_lea.vmem %s3848_s8, 512  ;;  %p3850_p3 = scmp.lt.s32.totalorder %s472_s30, %s3848_s8 }
  0xc0   : > { %p3845_p2 = pnand %p3843_p0, %p4170_p11  ;;  %p3851_p5 = scmp.lt.s32.totalorder %s3849_s3, %s3842_s21 }
  0xc2   : > { %p3846_p10 = pneg %p3845_p2  ;;  %p3852_p4 = por %p3851_p5, %p3850_p3 }
  0xc4   : > { %p3853_p13 = pnand %p3852_p4, %p3846_p10 }
  0xc6   : > { %3856 = shalt.err (!%p3853_p13)
}
  0xc7   : > { %3478 = dma.hbm_to_vmem [thread:$0]  (!%p4150_p12), %s4249_s12, 256, %s472_s30, %s4164_s28, %s5003_s17, %s5003_s17, %s5002_s1  }
  0xc8   : > { %p5004_p11 = scmp.ne.s32.totalorder %s4982_s24, 0 }
  0xca   : > { %483 = sbr.rel (%p5004_p11) target bundleno = 1320 (0x528), region = 64 }
  0xcf   : > { %s4300_s15 = sand.u32 1, %s3933_s18   ;;  %p5005_p1 = scmp.ne.s32.totalorder %s4990_s29, 0 }
  0xd0   : > { %s4303_s26 = sshll.u32 %s4300_s15, 4  ;;  %s486_s16 = scalar_lea.sflag [#allocation3], %s4300_s15 }
  0xd1   : > { %s489_s13 = scalar_lea.vmem [#allocation2], %s4303_s26 }
  0xd2   : > { %3900 = dma.done.wait (%p5005_p1), %s486_s16, 256  }
  0xd3   : > { %3902 = vsyncadd (%p5005_p1), %s486_s16, 4294967040  ;;  %s494_s24 = sand.u32 1, %s4043_s23   ;;  %s498_s12 = scalar_lea.vmem [#allocation5], %s4303_s26 }
  0xd4   : > { %s495_s28 = scalar_lea.sflag [#allocation6], %s494_s24 }
  0xd5   : > { %3904 = dma.done.wait (%p5005_p1), %s495_s28, 512  }
  0xd6   : > { %3906 = vsyncadd (%p5005_p1), %s495_s28, 4294966784  ;;  %s507_s1 = scalar_lea.vmem [#allocation7], %s4303_s26  ;;  %p5006_p12 = scmp.eq.s32.totalorder %s4043_s23, 0 }
  0xd8   : > { %3908 = dma.done.wait (%p5006_p12), [#allocation9], 256   ;;  %p5007_p6 = pmov %p5006_p12 }
  0xda   : > { %3910 = vsyncadd (%p5007_p6), [#allocation9], 4294967040  ;;  %p5008_p7 = pmov %p5007_p6 }
  0xdb   : > { %p5009_p8 = pmov %p5007_p6 }
  0xdc   : > { %3912 = dma.done.wait (%p5008_p7), [#allocation12], 1152  }
  0xdd   : > { %3914 = vsyncadd (%p5009_p8), [#allocation12], 4294966144  ;;  %p5010_p9 = pmov %p5007_p6 }
  0xde   : > { %p5011_p0 = pmov %p5007_p6 }
  0xdf   : > { %3916 = dma.done.wait (%p5010_p9), [#allocation15], 2048  }
  0xe0   : > { %3918 = vsyncadd (%p5011_p0), [#allocation15], 4294965248  ;;  %p5012_p2 = pmov %p5011_p0 }
  0xe1   : > { %p5013_p10 = pmov %p5011_p0 }
  0xe2   : > { %3920 = dma.done.wait (%p5012_p2), [#allocation18], 1024  }
  0xe3   : > { %3922 = vsyncadd (%p5013_p10), [#allocation18], 4294966272  ;;  %v4967_v0 = vmov 0.0   ;;  %vm3958_vm0 = vmmov 0   ;;  %v657_v1 = vld [vmem:[%s489_s13] sm:$0xff]  ;;  %v658_v2 = vld [vmem:[%s489_s13 + $0x8] sm:$0xff] }
  0xe4   : > { %2943 = vmatprep.subr.bf16.mxu0 %v4967_v0  ;;  %2949 = vmatprep.subr.bf16.mxu1 %v4967_v0  ;;  %v659_v3 = vpack.c.bf16 %v658_v2, %v657_v1  ;;  %v4340_v4 = vld [vmem:[#allocation8] sm:$0xff]   ;;  %vm670_vm1 = vcmask 130048   ;;  %v4358_v11 = vld [vmem:[#allocation10] sm:$0xff]   ;;  %v4365_v12 = vld [vmem:[#allocation11] sm:$0xff]   ;;  %s583_s30 = scalar_lea.vmem [#allocation19], %s4303_s26  ;;  %s2744_s25 = sshll.u32 %s4043_s23, 8 }
  0xe5   : > { %2945 = vmatprep.mubr.msk.bf16.mxu0 %vm3958_vm0, %v4967_v0  ;;  %2951 = vmatprep.mubr.msk.bf16.mxu1 %vm3958_vm0, %v4967_v0  ;;  %v4351_v10 = vld [vmem:[%s4937_s5] sm:$0xff]   ;;  %v4368_v13 = vld [vmem:[#allocation13 + $0x38] sm:$0xff]   ;;  %v4374_v14 = vld [vmem:[#allocation13 + $0x30] sm:$0xff]   ;;  %s2468_s27 = sshll.u32 %s583_s30, 4  ;;  %s5021_s20 = sld [smem:[#allocation39_spill]]  ;;  %s4884_s27 = int_to_ptr.vmem [resolvable:$true] %s2468_s27 }
  0xe6   : > { %v660_v5 = vunpack.c.l.bf16 %v659_v3  ;;  %v661_v6 = vunpack.c.h.bf16 %v659_v3  ;;  %2950 = vmatpush3.bf16.msra.mxu1 %v659_v3  ;;  %v4379_v15 = vld [vmem:[#allocation14 + $0x38] sm:$0xff]   ;;  %v4385_v16 = vld [vmem:[#allocation13 + $0x28] sm:$0xff]   ;;  %v4392_v17 = vld [vmem:[#allocation14 + $0x30] sm:$0xff]   ;;  %s2455_s8 = scalar_lea.sflag [#allocation4], %s4300_s15  ;;  %s3857_s3 = scalar_lea.vmem %s4884_s27, 256 }
  0xe7   : > { %2961 = vmatprep.subr.bf16.mxu1 %v4967_v0  ;;  %v4398_v18 = vld [vmem:[#allocation13 + $0x20] sm:$0xff]   ;;  %v4402_v19 = vld [vmem:[#allocation14 + $0x28] sm:$0xff]   ;;  %v4413_v21 = vld [vmem:[#allocation14 + $0x18] sm:$0xff]   ;;  %p3858_p3 = scmp.ne.s32.totalorder %s4884_s27, %s3857_s3  ;;  %p5023_p5 = scmp.ne.s32.totalorder %s4991_s22, 0 }
  0xe8   : > { %v662_v7 = vsub.f32 %v657_v1, %v660_v5  ;;  %v663_v8 = vsub.f32 %v658_v2, %v661_v6  ;;  %v4408_v20 = vld [vmem:[#allocation14 + $0x20] sm:$0xff]   ;;  %v4415_v22 = vld [vmem:[#allocation13 + $0x18] sm:$0xff]   ;;  %v4421_v23 = vld [vmem:[#allocation14 + $0x10] sm:$0xff]   ;;  %s3959_s23 = smov [#allocation19]  }
  0xe9   : > { %2952 = vmatmul.mubr.msk.bf16.vlgmr.msra.gmra.mxu1 %vm670_vm1, %v4340_v4  ;;  %v4423_v24 = vld [vmem:[#allocation13 + $0x10] sm:$0xff]   ;;  %v4429_v25 = vld [vmem:[#allocation14 + $0x8] sm:$0xff]   ;;  %v4437_v27 = vld [vmem:[#allocation14] sm:$0xff]   ;;  %p3859_p4 = pnand %p3858_p3, %p5023_p5  ;;  %s3861_s26 = sshll.u32 %s3959_s23, 4  ;;  %s3862_s26 = int_to_ptr.vmem [resolvable:$false] %s3861_s26 }
  0xea   : > { %v664_v9 = vpack.c.bf16 %v663_v8, %v662_v7  ;;  %2963 = vmatprep.mubr.msk.bf16.mxu1 %vm3958_vm0, %v4967_v0  ;;  %v4431_v26 = vld [vmem:[#allocation13 + $0x8] sm:$0xff]   ;;  %v4439_v28 = vld [vmem:[#allocation13] sm:$0xff]   ;;  %v4445_v51 = vld [vmem:[#allocation17 + $0x38] sm:$0xff]   ;;  %s3863_s16 = scalar_lea.vmem %s3862_s26, 512  ;;  %p3864_p11 = scmp.lt.s32.totalorder %s4884_s27, %s3862_s26 }
  0xeb   : > { %v4453_v56 = vld [vmem:[#allocation17 + $0x30] sm:$0xff]   ;;  %v4463_v59 = vld [vmem:[#allocation17 + $0x28] sm:$0xff]   ;;  %v4469_v61 = vld [vmem:[#allocation17 + $0x20] sm:$0xff]   ;;  %s5022_s21 = smov %s5021_s20  ;;  %s4889_s6 = scalar_lea.hbm %s5021_s20, %s2744_s25 }
  0xec   : > { %2944 = vmatpush3.bf16.msra.mxu0 %v664_v9  ;;  %2962 = vmatpush3.bf16.msra.mxu1 %v664_v9  ;;  %v4475_v62 = vld [vmem:[#allocation17 + $0x18] sm:$0xff]   ;;  %v4481_v63 = vld [vmem:[#allocation17 + $0x10] sm:$0xff]   ;;  %v4495_v9 = vld [vmem:[#allocation17] sm:$0xff]   ;;  %p3860_p13 = pneg %p3859_p4  ;;  %p3865_p1 = scmp.lt.s32.totalorder %s3863_s16, %s3857_s3 }
  0xed   : > { %2955 = vmatprep.subr.bf16.mxu0 %v4967_v0  ;;  %2973 = vmatprep.subr.bf16.mxu1 %v4967_v0 }
  0xee   : > { %p3866_p12 = por %p3865_p1, %p3864_p11 }
  0xef   : > { %2946 = vmatmul.mubr.msk.bf16.vlgmr.msra.gmra.mxu0 %vm670_vm1, %v4340_v4 }
  0xf0   : > { %2956 = vmatpush3.bf16.msra.mxu0 %v659_v3  ;;  %2957 = vmatprep.mubr.msk.bf16.mxu0 %vm3958_vm0, %v4967_v0  ;;  %p3867_p6 = pnand %p3866_p12, %p3860_p13 }
  0xf1   : > { %2964 = vmatmul.mubr.msk.bf16.vlgmr.msra.gmra.mxu1 %vm670_vm1, %v4351_v10  ;;  %2967 = vmatprep.subr.bf16.mxu0 %v4967_v0 }
  0xf2   : > { %2974 = vmatpush3.bf16.msra.mxu1 %v659_v3  ;;  %2975 = vmatprep.mubr.msk.bf16.mxu1 %vm3958_vm0, %v4967_v0 }
  0xf3   : > { %2999 = vmatprep.subr.bf16.mxu1 %v4967_v0 }
  0xf7   : > { %2958 = vmatmul.mubr.msk.bf16.vlgmr.msra.gmra.mxu0 %vm670_vm1, %v4358_v11 }
  0xf8   : > { %2968 = vmatpush3.bf16.msra.mxu0 %v659_v3  ;;  %2969 = vmatprep.mubr.msk.bf16.mxu0 %vm3958_vm0, %v4967_v0  ;;  %v4487_v3 = vld [vmem:[#allocation17 + $0x8] sm:$0xff]  }
  0xf9   : > { %2976 = vmatmul.mubr.msk.bf16.vlgmr.msra.gmra.mxu1 %vm670_vm1, %v4365_v12  ;;  %2979 = vmatprep.subr.bf16.mxu0 %v4967_v0 }
  0xfa   : > { %3000 = vmatpush3.bf16.msra.mxu1 %v4368_v13  ;;  %3015 = vmatprep.mubr.msk.bf16.mxu1 %vm3958_vm0, %v4967_v0 }
  0xfb   : > { %3001 = vmatprep.subr.bf16.mxu1 %v4967_v0 }
  0xfe   : > { %3002 = vmatpush3.bf16.msra.mxu1 %v4374_v14 }
  0xff   : > { %2970 = vmatmul.mubr.msk.bf16.vlgmr.msra.gmra.mxu0 %vm670_vm1, %v4351_v10  ;;  %3003 = vmatprep.subr.bf16.mxu1 %v4967_v0 }
 0x100   : > { %2980 = vmatpush3.bf16.msra.mxu0 %v4379_v15  ;;  %2995 = vmatprep.mubr.msk.bf16.mxu0 %vm3958_vm0, %v4967_v0 }
 0x101   : > { %2981 = vmatprep.subr.bf16.mxu0 %v4967_v0 }
 0x102   : > { %3004 = vmatpush3.bf16.msra.mxu1 %v4385_v16 }
 0x103   : > { %3005 = vmatprep.subr.bf16.mxu1 %v4967_v0 }
 0x104   : > { %2982 = vmatpush3.bf16.msra.mxu0 %v4392_v17 }
 0x105   : > { %2983 = vmatprep.subr.bf16.mxu0 %v4967_v0 }
 0x106   : > { %3006 = vmatpush3.bf16.msra.mxu1 %v4398_v18 }
 0x107   : > { %3007 = vmatprep.subr.bf16.mxu1 %v4967_v0 }
 0x108   : > { %2984 = vmatpush3.bf16.msra.mxu0 %v4402_v19 }
 0x109   : > { %2985 = vmatprep.subr.bf16.mxu0 %v4967_v0 }
 0x10a   : > { %3008 = vmatpush3.bf16.msra.mxu1 %v4415_v22 }
 0x10b   : > { %3009 = vmatprep.subr.bf16.mxu1 %v4967_v0 }
 0x10c   : > { %2986 = vmatpush3.bf16.msra.mxu0 %v4408_v20 }
 0x10d   : > { %2987 = vmatprep.subr.bf16.mxu0 %v4967_v0 }
 0x10e   : > { %3010 = vmatpush3.bf16.msra.mxu1 %v4423_v24 }
 0x10f   : > { %3011 = vmatprep.subr.bf16.mxu1 %v4967_v0 }
 0x110   : > { %2988 = vmatpush3.bf16.msra.mxu0 %v4413_v21 }
 0x111   : > { %2989 = vmatprep.subr.bf16.mxu0 %v4967_v0 }
 0x112   : > { %3012 = vmatpush3.bf16.msra.mxu1 %v4431_v26 }
 0x113   : > { %3013 = vmatprep.subr.bf16.mxu1 %v4967_v0 }
 0x114   : > { %2990 = vmatpush3.bf16.msra.mxu0 %v4421_v23 }
 0x115   : > { %2991 = vmatprep.subr.bf16.mxu0 %v4967_v0 }
 0x116   : > { %3014 = vmatpush3.bf16.msra.mxu1 %v4439_v28 }
 0x117   : > { %3039 = vmatprep.subr.bf16.mxu1 %v4967_v0 }
 0x118   : > { %2992 = vmatpush3.bf16.msra.mxu0 %v4429_v25 }
 0x119   : > { %2993 = vmatprep.subr.bf16.mxu0 %v4967_v0 }
 0x11c   : > { %2994 = vmatpush3.bf16.msra.mxu0 %v4437_v27 }
 0x11d   : > { %3019 = vmatprep.subr.bf16.mxu0 %v4967_v0 }
 0x1a9   : > { %v749_v29 = vpop.f32.mrf.mxu1 }
 0x1ab   : > { %v2953_v30 = vpop.f32.mrf.mxu1 }
 0x1ad   : > { %v752_v31 = vpop.f32.mrf.mxu1 }
 0x1af   : > { %v708_v32 = vpop.f32.mrf.mxu0  ;;  %v2954_v33 = vpop.f32.mrf.mxu1 }
 0x1b0   : > { %v750_v44 = vadd.f32 %v749_v29, %v708_v32  ;;  %v4501_v33 = vld [vmem:[#allocation16 + $0x38] sm:$0xff]  }
 0x1b1   : > { %v2947_v34 = vpop.f32.mrf.mxu0  ;;  %v849_v35 = vpop.f32.mrf.mxu1 }
 0x1b3   : > { %v711_v36 = vpop.f32.mrf.mxu0  ;;  %v2965_v37 = vpop.f32.mrf.mxu1 }
 0x1b4   : > { %v753_v45 = vadd.f32 %v752_v31, %v711_v36  ;;  %v4513_v36 = vld [vmem:[#allocation16 + $0x30] sm:$0xff]   ;;  %v4523_v37 = vld [vmem:[#allocation16 + $0x28] sm:$0xff]  }
 0x1b5   : > { %v2948_v38 = vpop.f32.mrf.mxu0  ;;  %v852_v39 = vpop.f32.mrf.mxu1 }
 0x1b6   : > { %v4529_v38 = vld [vmem:[#allocation16 + $0x20] sm:$0xff]  }
 0x1b7   : > { %v798_v40 = vpop.f32.mrf.mxu0  ;;  %v2966_v41 = vpop.f32.mrf.mxu1 }
 0x1b8   : > { %v805_v48 = vadd.f32 %v798_v40, %v750_v44  ;;  %v4541_v40 = vld [vmem:[#allocation16 + $0x10] sm:$0xff]   ;;  %v4547_v41 = vld [vmem:[#allocation16 + $0x8] sm:$0xff]   ;;  %v4555_v44 = vld [vmem:[#allocation16] sm:$0xff]  }
 0x1b9   : > { %v2959_v42 = vpop.f32.mrf.mxu0  ;;  %v939_v43 = vpop.f32.mrf.mxu1  ;;  %5014 = vst [vmem:[#allocation32_spill] sm:$0xff] %v4541_v40  ;;  %5015 = vst [vmem:[#allocation33_spill] sm:$0xff] %v4547_v41 }
 0x1ba   : > { %5016 = vst [vmem:[#allocation34_spill] sm:$0xff] %v4555_v44 }
 0x1bb   : > { %v801_v46 = vpop.f32.mrf.mxu0  ;;  %v2977_v47 = vpop.f32.mrf.mxu1 }
 0x1bc   : > { %v806_v49 = vadd.f32 %v801_v46, %v753_v45 }
 0x1bd   : > { %v2960_v50 = vpop.f32.mrf.mxu0  ;;  %v942_v52 = vpop.f32.mrf.mxu1 }
 0x1be   : > { %v4447_v53 = vpack.c.bf16 %v806_v49, %v805_v48 }
 0x1bf   : > { %v890_v54 = vpop.f32.mrf.mxu0  ;;  %v2978_v55 = vpop.f32.mrf.mxu1 }
 0x1c0   : > { %2996 = vmatmul.mubr.bf16.vlgmr.msra.gmra.mxu0 %v4447_v53  ;;  %3016 = vmatmul.mubr.bf16.vlgmr.msra.gmra.mxu1 %v4447_v53  ;;  %v891_v1 = vadd.f32 %v890_v54, %v849_v35  ;;  %v951_v5 = vunpack.c.l.bf16 %v4447_v53  ;;  %v952_v6 = vunpack.c.h.bf16 %v4447_v53 }
 0x1c1   : > { %3020 = vmatpush3.bf16.msra.mxu0 %v4368_v13  ;;  %3040 = vmatpush3.bf16.msra.mxu1 %v4445_v51  ;;  %v2971_v57 = vpop.f32.mrf.mxu0 }
 0x1c2   : > { %3021 = vmatprep.subr.bf16.mxu0 %v4967_v0  ;;  %3041 = vmatprep.subr.bf16.mxu1 %v4967_v0  ;;  %v946_v7 = vadd.f32 %v939_v43, %v891_v1  ;;  %v953_v29 = vsub.f32 %v805_v48, %v951_v5  ;;  %v954_v30 = vsub.f32 %v806_v49, %v952_v6 }
 0x1c3   : > { %v893_v58 = vpop.f32.mrf.mxu0  ;;  %3035 = vmatprep.mubr.msk.bf16.mxu0 %vm3958_vm0, %v4967_v0  ;;  %3055 = vmatprep.mubr.msk.bf16.mxu1 %vm3958_vm0, %v4967_v0 }
 0x1c4   : > { %v894_v2 = vadd.f32 %v893_v58, %v852_v39  ;;  %v948_v31 = vsub.f32 0.0, %v946_v7  ;;  %v4503_v34 = vpack.c.bf16 %v954_v30, %v953_v29  ;;  %v4535_v39 = vld [vmem:[#allocation16 + $0x18] sm:$0xff]  }
 0x1c5   : > { %3022 = vmatpush3.bf16.msra.mxu0 %v4374_v14  ;;  %3042 = vmatpush3.bf16.msra.mxu1 %v4453_v56  ;;  %v2972_v60 = vpop.f32.mrf.mxu0 }
 0x1c6   : > { %3023 = vmatprep.subr.bf16.mxu0 %v4967_v0  ;;  %3043 = vmatprep.subr.bf16.mxu1 %v4967_v0  ;;  %v947_v8 = vadd.f32 %v942_v52, %v894_v2 }
 0x1c8   : > { %v949_v32 = vsub.f32 0.0, %v947_v8 }
 0x1c9   : > { %3024 = vmatpush3.bf16.msra.mxu0 %v4385_v16  ;;  %3044 = vmatpush3.bf16.msra.mxu1 %v4463_v59 }
 0x1ca   : > { %3025 = vmatprep.subr.bf16.mxu0 %v4967_v0  ;;  %3045 = vmatprep.subr.bf16.mxu1 %v4967_v0  ;;  %v4505_v35 = vpack.c.bf16 %v949_v32, %v948_v31 }
 0x1cc   : > { %v957_v42 = vunpack.c.l.bf16 %v4505_v35  ;;  %v958_v43 = vunpack.c.h.bf16 %v4505_v35 }
 0x1cd   : > { %3026 = vmatpush3.bf16.msra.mxu0 %v4398_v18  ;;  %3046 = vmatpush3.bf16.msra.mxu1 %v4469_v61 }
 0x1ce   : > { %3027 = vmatprep.subr.bf16.mxu0 %v4967_v0  ;;  %3047 = vmatprep.subr.bf16.mxu1 %v4967_v0  ;;  %v959_v45 = vsub.f32 %v948_v31, %v957_v42  ;;  %v960_v46 = vsub.f32 %v949_v32, %v958_v43 }
 0x1d0   : > { %v4561_v47 = vpack.c.bf16 %v960_v46, %v959_v45  ;;  %v4687_v45 = vld [vmem:[%s507_s1] sm:$0xff] }
 0x1d1   : > { %3028 = vmatpush3.bf16.msra.mxu0 %v4415_v22  ;;  %3048 = vmatpush3.bf16.msra.mxu1 %v4475_v62 }
 0x1d2   : > { %3029 = vmatprep.subr.bf16.mxu0 %v4967_v0  ;;  %3049 = vmatprep.subr.bf16.mxu1 %v4967_v0 }
 0x1d5   : > { %3030 = vmatpush3.bf16.msra.mxu0 %v4423_v24  ;;  %3050 = vmatpush3.bf16.msra.mxu1 %v4481_v63 }
 0x1d6   : > { %3031 = vmatprep.subr.bf16.mxu0 %v4967_v0  ;;  %3051 = vmatprep.subr.bf16.mxu1 %v4967_v0 }
 0x1d9   : > { %3032 = vmatpush3.bf16.msra.mxu0 %v4431_v26  ;;  %3052 = vmatpush3.bf16.msra.mxu1 %v4487_v3 }
 0x1da   : > { %3033 = vmatprep.subr.bf16.mxu0 %v4967_v0  ;;  %3053 = vmatprep.subr.bf16.mxu1 %v4967_v0 }
 0x1dd   : > { %3034 = vmatpush3.bf16.msra.mxu0 %v4439_v28  ;;  %3054 = vmatpush3.bf16.msra.mxu1 %v4495_v9 }
 0x1de   : > { %3059 = vmatprep.subr.bf16.mxu0 %v4967_v0  ;;  %3079 = vmatprep.subr.bf16.mxu1 %v4967_v0 }
 0x1e0   : > { %3036 = vmatmul.mubr.bf16.vlgmr.msra.gmra.mxu0 %v4503_v34  ;;  %3056 = vmatmul.mubr.bf16.vlgmr.msra.gmra.mxu1 %v4505_v35 }
 0x1e1   : > { %3060 = vmatpush3.bf16.msra.mxu0 %v4501_v33  ;;  %3080 = vmatpush3.bf16.msra.mxu1 %v4501_v33 }
 0x1e2   : > { %3061 = vmatprep.subr.bf16.mxu0 %v4967_v0  ;;  %3081 = vmatprep.subr.bf16.mxu1 %v4967_v0 }
 0x1e3   : > { %3075 = vmatprep.mubr.msk.bf16.mxu0 %vm3958_vm0, %v4967_v0  ;;  %3095 = vmatprep.mubr.msk.bf16.mxu1 %vm3958_vm0, %v4967_v0 }
 0x1e5   : > { %3062 = vmatpush3.bf16.msra.mxu0 %v4513_v36  ;;  %3082 = vmatpush3.bf16.msra.mxu1 %v4513_v36 }
 0x1e6   : > { %3063 = vmatprep.subr.bf16.mxu0 %v4967_v0  ;;  %3083 = vmatprep.subr.bf16.mxu1 %v4967_v0 }
 0x1e9   : > { %3064 = vmatpush3.bf16.msra.mxu0 %v4523_v37  ;;  %3084 = vmatpush3.bf16.msra.mxu1 %v4523_v37 }
 0x1ea   : > { %3065 = vmatprep.subr.bf16.mxu0 %v4967_v0  ;;  %3085 = vmatprep.subr.bf16.mxu1 %v4967_v0 }
 0x1ed   : > { %3066 = vmatpush3.bf16.msra.mxu0 %v4529_v38  ;;  %3086 = vmatpush3.bf16.msra.mxu1 %v4529_v38 }
 0x1ee   : > { %3067 = vmatprep.subr.bf16.mxu0 %v4967_v0  ;;  %3087 = vmatprep.subr.bf16.mxu1 %v4967_v0 }
 0x1f1   : > { %3068 = vmatpush3.bf16.msra.mxu0 %v4535_v39  ;;  %3088 = vmatpush3.bf16.msra.mxu1 %v4535_v39 }
 0x1f2   : > { %3069 = vmatprep.subr.bf16.mxu0 %v4967_v0  ;;  %3089 = vmatprep.subr.bf16.mxu1 %v4967_v0 }
 0x1f5   : > { %3070 = vmatpush3.bf16.msra.mxu0 %v4541_v40  ;;  %3090 = vmatpush3.bf16.msra.mxu1 %v4541_v40 }
 0x1f6   : > { %3071 = vmatprep.subr.bf16.mxu0 %v4967_v0  ;;  %3091 = vmatprep.subr.bf16.mxu1 %v4967_v0 }
 0x1f9   : > { %3072 = vmatpush3.bf16.msra.mxu0 %v4547_v41  ;;  %3092 = vmatpush3.bf16.msra.mxu1 %v4547_v41 }
 0x1fa   : > { %3073 = vmatprep.subr.bf16.mxu0 %v4967_v0  ;;  %3093 = vmatprep.subr.bf16.mxu1 %v4967_v0 }
 0x1fd   : > { %3074 = vmatpush3.bf16.msra.mxu0 %v4555_v44  ;;  %3094 = vmatpush3.bf16.msra.mxu1 %v4555_v44 }
 0x1fe   : > { %3099 = vmatprep.subr.bf16.mxu0 %v4967_v0  ;;  %3119 = vmatprep.subr.bf16.mxu1 %v4967_v0 }
 0x200   : > { %3076 = vmatmul.mubr.bf16.vlgmr.msra.gmra.mxu0 %v4505_v35  ;;  %3096 = vmatmul.mubr.bf16.vlgmr.msra.gmra.mxu1 %v4561_v47 }
 0x201   : > { %3100 = vmatpush3.bf16.msra.mxu0 %v4379_v15  ;;  %3120 = vmatpush3.bf16.msra.mxu1 %v4368_v13 }
 0x202   : > { %3101 = vmatprep.subr.bf16.mxu0 %v4967_v0  ;;  %3121 = vmatprep.subr.bf16.mxu1 %v4967_v0 }
 0x203   : > { %3115 = vmatprep.mubr.msk.bf16.mxu0 %vm3958_vm0, %v4967_v0  ;;  %3135 = vmatprep.mubr.msk.bf16.mxu1 %vm3958_vm0, %v4967_v0 }
 0x205   : > { %3102 = vmatpush3.bf16.msra.mxu0 %v4392_v17  ;;  %3122 = vmatpush3.bf16.msra.mxu1 %v4374_v14 }
 0x206   : > { %3103 = vmatprep.subr.bf16.mxu0 %v4967_v0  ;;  %3123 = vmatprep.subr.bf16.mxu1 %v4967_v0 }
 0x209   : > { %3104 = vmatpush3.bf16.msra.mxu0 %v4402_v19  ;;  %3124 = vmatpush3.bf16.msra.mxu1 %v4385_v16 }
 0x20a   : > { %3105 = vmatprep.subr.bf16.mxu0 %v4967_v0  ;;  %3125 = vmatprep.subr.bf16.mxu1 %v4967_v0 }
 0x20d   : > { %3106 = vmatpush3.bf16.msra.mxu0 %v4408_v20  ;;  %3126 = vmatpush3.bf16.msra.mxu1 %v4398_v18 }
 0x20e   : > { %3107 = vmatprep.subr.bf16.mxu0 %v4967_v0  ;;  %3127 = vmatprep.subr.bf16.mxu1 %v4967_v0 }
 0x211   : > { %3108 = vmatpush3.bf16.msra.mxu0 %v4413_v21  ;;  %3128 = vmatpush3.bf16.msra.mxu1 %v4415_v22 }
 0x212   : > { %3109 = vmatprep.subr.bf16.mxu0 %v4967_v0  ;;  %3129 = vmatprep.subr.bf16.mxu1 %v4967_v0 }
 0x215   : > { %3110 = vmatpush3.bf16.msra.mxu0 %v4421_v23  ;;  %3130 = vmatpush3.bf16.msra.mxu1 %v4423_v24 }
 0x216   : > { %3111 = vmatprep.subr.bf16.mxu0 %v4967_v0  ;;  %3131 = vmatprep.subr.bf16.mxu1 %v4967_v0 }
 0x219   : > { %3112 = vmatpush3.bf16.msra.mxu0 %v4429_v25  ;;  %3132 = vmatpush3.bf16.msra.mxu1 %v4431_v26 }
 0x21a   : > { %3113 = vmatprep.subr.bf16.mxu0 %v4967_v0  ;;  %3133 = vmatprep.subr.bf16.mxu1 %v4967_v0 }
 0x21d   : > { %3114 = vmatpush3.bf16.msra.mxu0 %v4437_v27  ;;  %3134 = vmatpush3.bf16.msra.mxu1 %v4439_v28 }
 0x21e   : > { %3139 = vmatprep.subr.bf16.mxu0 %v4967_v0  ;;  %3159 = vmatprep.subr.bf16.mxu1 %v4967_v0 }
 0x220   : > { %3116 = vmatmul.mubr.bf16.vlgmr.msra.gmra.mxu0 %v4505_v35  ;;  %3136 = vmatmul.mubr.bf16.vlgmr.msra.gmra.mxu1 %v4505_v35 }
 0x221   : > { %3140 = vmatpush3.bf16.msra.mxu0 %v4368_v13  ;;  %3160 = vmatpush3.bf16.msra.mxu1 %v4445_v51 }
 0x222   : > { %3141 = vmatprep.subr.bf16.mxu0 %v4967_v0  ;;  %3161 = vmatprep.subr.bf16.mxu1 %v4967_v0 }
 0x223   : > { %3155 = vmatprep.mubr.msk.bf16.mxu0 %vm3958_vm0, %v4967_v0  ;;  %3175 = vmatprep.mubr.msk.bf16.mxu1 %vm3958_vm0, %v4967_v0 }
 0x225   : > { %3142 = vmatpush3.bf16.msra.mxu0 %v4374_v14  ;;  %3162 = vmatpush3.bf16.msra.mxu1 %v4453_v56 }
 0x226   : > { %3143 = vmatprep.subr.bf16.mxu0 %v4967_v0  ;;  %3163 = vmatprep.subr.bf16.mxu1 %v4967_v0 }
 0x229   : > { %3144 = vmatpush3.bf16.msra.mxu0 %v4385_v16  ;;  %3164 = vmatpush3.bf16.msra.mxu1 %v4463_v59 }
 0x22a   : > { %3145 = vmatprep.subr.bf16.mxu0 %v4967_v0  ;;  %3165 = vmatprep.subr.bf16.mxu1 %v4967_v0 }
 0x22d   : > { %3146 = vmatpush3.bf16.msra.mxu0 %v4398_v18  ;;  %3166 = vmatpush3.bf16.msra.mxu1 %v4469_v61 }
 0x22e   : > { %3147 = vmatprep.subr.bf16.mxu0 %v4967_v0  ;;  %3167 = vmatprep.subr.bf16.mxu1 %v4967_v0 }
 0x231   : > { %3148 = vmatpush3.bf16.msra.mxu0 %v4415_v22  ;;  %3168 = vmatpush3.bf16.msra.mxu1 %v4475_v62 }
 0x232   : > { %3149 = vmatprep.subr.bf16.mxu0 %v4967_v0  ;;  %3169 = vmatprep.subr.bf16.mxu1 %v4967_v0 }
 0x235   : > { %3150 = vmatpush3.bf16.msra.mxu0 %v4423_v24  ;;  %3170 = vmatpush3.bf16.msra.mxu1 %v4481_v63 }
 0x236   : > { %3151 = vmatprep.subr.bf16.mxu0 %v4967_v0  ;;  %3171 = vmatprep.subr.bf16.mxu1 %v4967_v0 }
 0x239   : > { %3152 = vmatpush3.bf16.msra.mxu0 %v4431_v26  ;;  %3172 = vmatpush3.bf16.msra.mxu1 %v4487_v3 }
 0x23a   : > { %3153 = vmatprep.subr.bf16.mxu0 %v4967_v0  ;;  %3173 = vmatprep.subr.bf16.mxu1 %v4967_v0 }
 0x23d   : > { %3154 = vmatpush3.bf16.msra.mxu0 %v4439_v28  ;;  %3174 = vmatpush3.bf16.msra.mxu1 %v4495_v9 }
 0x23e   : > { %3179 = vmatprep.subr.bf16.mxu0 %v4967_v0  ;;  %3199 = vmatprep.subr.bf16.mxu1 %v4967_v0 }
 0x240   : > { %3156 = vmatmul.mubr.bf16.vlgmr.msra.gmra.mxu0 %v4561_v47  ;;  %3176 = vmatmul.mubr.bf16.vlgmr.msra.gmra.mxu1 %v4447_v53 }
 0x241   : > { %3180 = vmatpush3.bf16.msra.mxu0 %v4501_v33  ;;  %3200 = vmatpush3.bf16.msra.mxu1 %v4501_v33 }
 0x242   : > { %3181 = vmatprep.subr.bf16.mxu0 %v4967_v0  ;;  %3201 = vmatprep.subr.bf16.mxu1 %v4967_v0 }
 0x243   : > { %3195 = vmatprep.mubr.msk.bf16.mxu0 %vm3958_vm0, %v4967_v0  ;;  %3215 = vmatprep.mubr.msk.bf16.mxu1 %vm3958_vm0, %v4967_v0 }
 0x245   : > { %3182 = vmatpush3.bf16.msra.mxu0 %v4513_v36  ;;  %3202 = vmatpush3.bf16.msra.mxu1 %v4513_v36 }
 0x246   : > { %3183 = vmatprep.subr.bf16.mxu0 %v4967_v0  ;;  %3203 = vmatprep.subr.bf16.mxu1 %v4967_v0 }
 0x249   : > { %3184 = vmatpush3.bf16.msra.mxu0 %v4523_v37  ;;  %3204 = vmatpush3.bf16.msra.mxu1 %v4523_v37 }
 0x24a   : > { %3185 = vmatprep.subr.bf16.mxu0 %v4967_v0  ;;  %3205 = vmatprep.subr.bf16.mxu1 %v4967_v0 }
 0x24d   : > { %3186 = vmatpush3.bf16.msra.mxu0 %v4529_v38  ;;  %3206 = vmatpush3.bf16.msra.mxu1 %v4529_v38 }
 0x24e   : > { %3187 = vmatprep.subr.bf16.mxu0 %v4967_v0  ;;  %3207 = vmatprep.subr.bf16.mxu1 %v4967_v0 }
 0x251   : > { %3188 = vmatpush3.bf16.msra.mxu0 %v4535_v39  ;;  %3208 = vmatpush3.bf16.msra.mxu1 %v4535_v39 }
 0x252   : > { %3189 = vmatprep.subr.bf16.mxu0 %v4967_v0  ;;  %3209 = vmatprep.subr.bf16.mxu1 %v4967_v0 }
 0x255   : > { %3190 = vmatpush3.bf16.msra.mxu0 %v4541_v40  ;;  %3210 = vmatpush3.bf16.msra.mxu1 %v4541_v40 }
 0x256   : > { %3191 = vmatprep.subr.bf16.mxu0 %v4967_v0  ;;  %3211 = vmatprep.subr.bf16.mxu1 %v4967_v0 }
 0x259   : > { %3192 = vmatpush3.bf16.msra.mxu0 %v4547_v41  ;;  %3212 = vmatpush3.bf16.msra.mxu1 %v4547_v41 }
 0x25a   : > { %3193 = vmatprep.subr.bf16.mxu0 %v4967_v0  ;;  %3213 = vmatprep.subr.bf16.mxu1 %v4967_v0 }
 0x25d   : > { %3194 = vmatpush3.bf16.msra.mxu0 %v4555_v44  ;;  %3214 = vmatpush3.bf16.msra.mxu1 %v4555_v44 }
 0x25e   : > { %3225 = vmatprep.subr.bf16.mxu1 %v4967_v0  ;;  %3219 = vmatprep.subr.bf16.mxu0 %v4967_v0 }
 0x260   : > { %3196 = vmatmul.mubr.bf16.vlgmr.msra.gmra.mxu0 %v4447_v53  ;;  %3216 = vmatmul.mubr.bf16.vlgmr.msra.gmra.mxu1 %v4503_v34 }
 0x261   : > { %3221 = vmatprep.mubr.msk.bf16.mxu0 %vm3958_vm0, %v4967_v0  ;;  %3227 = vmatprep.mubr.msk.bf16.mxu1 %vm3958_vm0, %v4967_v0 }
 0x280   : > { %v1044_v48 = vpop.f32.mrf.mxu0  ;;  %v1133_v49 = vpop.f32.mrf.mxu1 }
 0x281   : > { %v1134_v50 = vadd.f32 %v1133_v49, %v1044_v48  ;;  %v4691_v48 = vld [vmem:[%s507_s1 + $0x8] sm:$0xff] }
 0x282   : > { %v2997_v52 = vpop.f32.mrf.mxu0  ;;  %v3017_v54 = vpop.f32.mrf.mxu1 }
 0x283   : > { %v1660_v54 = vsub.f32 1.0, %v4687_v45 }
 0x284   : > { %v1047_v55 = vpop.f32.mrf.mxu0  ;;  %v1136_v57 = vpop.f32.mrf.mxu1 }
 0x285   : > { %v1137_v58 = vadd.f32 %v1136_v57, %v1047_v55 }
 0x286   : > { %v2998_v60 = vpop.f32.mrf.mxu0  ;;  %v3018_v1 = vpop.f32.mrf.mxu1 }
 0x2a0   : > { %v1174_v53 = vpop.f32.mrf.mxu0  ;;  %v1265_v2 = vpop.f32.mrf.mxu1 }
 0x2a1   : > { %v1181_v49 = vadd.f32 %v1174_v53, %v1134_v50 }
 0x2a2   : > { %v3037_v5 = vpop.f32.mrf.mxu0  ;;  %v3057_v6 = vpop.f32.mrf.mxu1 }
 0x2a3   : > { %v1661_v5 = vsub.f32 1.0, %v4691_v48 }
 0x2a4   : > { %v1177_v7 = vpop.f32.mrf.mxu0  ;;  %v1268_v8 = vpop.f32.mrf.mxu1 }
 0x2a5   : > { %v1182_v60 = vadd.f32 %v1177_v7, %v1137_v58 }
 0x2a6   : > { %v3038_v29 = vpop.f32.mrf.mxu0  ;;  %v3058_v30 = vpop.f32.mrf.mxu1 }
 0x2c0   : > { %v1354_v31 = vpop.f32.mrf.mxu0  ;;  %v1395_v32 = vpop.f32.mrf.mxu1 }
 0x2c1   : > { %v1355_v34 = vadd.f32 %v1354_v31, %v1265_v2 }
 0x2c2   : > { %v3077_v35 = vpop.f32.mrf.mxu0  ;;  %v3097_v42 = vpop.f32.mrf.mxu1 }
 0x2c3   : > { %v1402_v43 = vadd.f32 %v1395_v32, %v1355_v34 }
 0x2c4   : > { %v1357_v46 = vpop.f32.mrf.mxu0  ;;  %v1398_v47 = vpop.f32.mrf.mxu1 }
 0x2c5   : > { %v1358_v52 = vadd.f32 %v1357_v46, %v1268_v8  ;;  %v1404_v1 = vadd.f32 %v1402_v43, %v1181_v49 }
 0x2c6   : > { %v3078_v55 = vpop.f32.mrf.mxu0  ;;  %v3098_v57 = vpop.f32.mrf.mxu1 }
 0x2c7   : > { %v1403_v2 = vadd.f32 %v1398_v47, %v1358_v52  ;;  %v1662_v29 = vmul.f32 %v1660_v54, %v1404_v1 }
 0x2c9   : > { %v1405_v6 = vadd.f32 %v1403_v2, %v1182_v60 }
 0x2cb   : > { %v1663_v30 = vmul.f32 %v1661_v5, %v1405_v6 }
 0x2cd   : > { %v4695_v31 = vpack.c.bf16 %v1663_v30, %v1662_v29 }
 0x2cf   : > { %v1668_v32 = vunpack.c.h.bf16 %v4695_v31  ;;  %3226 = vmatpush3.bf16.msra.mxu1 %v4695_v31  ;;  %v1667_v50 = vunpack.c.l.bf16 %v4695_v31 }
 0x2d0   : > { %3237 = vmatprep.subr.bf16.mxu1 %v4967_v0 }
 0x2d1   : > { %v1670_v53 = vsub.f32 %v1663_v30, %v1668_v32  ;;  %v1669_v8 = vsub.f32 %v1662_v29, %v1667_v50 }
 0x2d2   : > { %3228 = vmatmul.mubr.msk.bf16.vlgmr.msra.gmra.mxu1 %vm670_vm1, %v4340_v4 }
 0x2d3   : > { %v4703_v58 = vpack.c.bf16 %v1670_v53, %v1669_v8  ;;  %3239 = vmatprep.mubr.msk.bf16.mxu1 %vm3958_vm0, %v4967_v0 }
 0x2d5   : > { %3220 = vmatpush3.bf16.msra.mxu0 %v4703_v58 }
 0x2d6   : > { %3231 = vmatprep.subr.bf16.mxu0 %v4967_v0 }
 0x2d8   : > { %3222 = vmatmul.mubr.msk.bf16.vlgmr.msra.gmra.mxu0 %vm670_vm1, %v4340_v4 }
 0x2d9   : > { %3232 = vmatpush3.bf16.msra.mxu0 %v4695_v31  ;;  %3233 = vmatprep.mubr.msk.bf16.mxu0 %vm3958_vm0, %v4967_v0 }
 0x2da   : > { %3243 = vmatprep.subr.bf16.mxu0 %v4967_v0 }
 0x2e0   : > { %v1440_v7 = vpop.f32.mrf.mxu0  ;;  %v1481_v34 = vpop.f32.mrf.mxu1  ;;  %3234 = vmatmul.mubr.msk.bf16.vlgmr.msra.gmra.mxu0 %vm670_vm1, %v4358_v11 }
 0x2e1   : > { %v1482_v35 = vadd.f32 %v1481_v34, %v1440_v7  ;;  %3245 = vmatprep.mubr.msk.bf16.mxu0 %vm3958_vm0, %v4967_v0 }
 0x2e2   : > { %v3117_v42 = vpop.f32.mrf.mxu0  ;;  %v3137_v43 = vpop.f32.mrf.mxu1 }
 0x2e4   : > { %v1443_v45 = vpop.f32.mrf.mxu0  ;;  %v1484_v46 = vpop.f32.mrf.mxu1 }
 0x2e5   : > { %v1485_v47 = vadd.f32 %v1484_v46, %v1443_v45 }
 0x2e6   : > { %v3118_v48 = vpop.f32.mrf.mxu0  ;;  %v3138_v49 = vpop.f32.mrf.mxu1 }
 0x300   : > { %v1522_v52 = vpop.f32.mrf.mxu0  ;;  %v1565_v55 = vpop.f32.mrf.mxu1 }
 0x301   : > { %v1529_v43 = vadd.f32 %v1522_v52, %v1482_v35 }
 0x302   : > { %v3157_v57 = vpop.f32.mrf.mxu0  ;;  %v3177_v60 = vpop.f32.mrf.mxu1 }
 0x304   : > { %v1525_v1 = vpop.f32.mrf.mxu0  ;;  %v1568_v2 = vpop.f32.mrf.mxu1 }
 0x305   : > { %v1530_v49 = vadd.f32 %v1525_v1, %v1485_v47 }
 0x306   : > { %v3158_v6 = vpop.f32.mrf.mxu0  ;;  %v3178_v29 = vpop.f32.mrf.mxu1 }
 0x320   : > { %v1606_v30 = vpop.f32.mrf.mxu0  ;;  %v1647_v32 = vpop.f32.mrf.mxu1 }
 0x321   : > { %v1607_v50 = vadd.f32 %v1606_v30, %v1565_v55  ;;  %v5017_v55 = vmov 0.0  }
 0x322   : > { %v3197_v53 = vpop.f32.mrf.mxu0  ;;  %v3217_v8 = vpop.f32.mrf.mxu1 }
 0x323   : > { %v1654_v7 = vadd.f32 %v1647_v32, %v1607_v50 }
 0x324   : > { %v1609_v34 = vpop.f32.mrf.mxu0  ;;  %v1650_v42 = vpop.f32.mrf.mxu1 }
 0x325   : > { %v1610_v45 = vadd.f32 %v1609_v34, %v1568_v2  ;;  %v1656_v0 = vsub.f32 %v1529_v43, %v1654_v7 }
 0x326   : > { %v3198_v46 = vpop.f32.mrf.mxu0  ;;  %v3218_v48 = vpop.f32.mrf.mxu1 }
 0x327   : > { %v1655_v57 = vadd.f32 %v1650_v42, %v1610_v45  ;;  %v1664_v44 = vmul.f32 %v1660_v54, %v1656_v0  ;;  %v3582_v0 = vld [vmem:[#allocation8] sm:$0xff]  }
 0x329   : > { %v1657_v60 = vsub.f32 %v1530_v49, %v1655_v57 }
 0x32b   : > { %v1665_v41 = vmul.f32 %v1661_v5, %v1657_v60 }
 0x32d   : > { %v1672_v6 = vpack.c.bf16 %v1665_v41, %v1664_v44 }
 0x32f   : > { %v1674_v29 = vunpack.c.h.bf16 %v1672_v6  ;;  %3244 = vmatpush3.bf16.msra.mxu0 %v1672_v6  ;;  %v1673_v40 = vunpack.c.l.bf16 %v1672_v6 }
 0x330   : > { %3255 = vmatprep.subr.bf16.mxu0 %v5017_v55 }
 0x331   : > { %v1676_v30 = vsub.f32 %v1665_v41, %v1674_v29  ;;  %v1675_v32 = vsub.f32 %v1664_v44, %v1673_v40 }
 0x332   : > { %3246 = vmatmul.mubr.msk.bf16.vlgmr.msra.gmra.mxu0 %vm670_vm1, %v4351_v10 }
 0x333   : > { %v1677_v35 = vpack.c.bf16 %v1676_v30, %v1675_v32  ;;  %3257 = vmatprep.mubr.msk.bf16.mxu0 %vm3958_vm0, %v5017_v55 }
 0x335   : > { %3238 = vmatpush3.bf16.msra.mxu1 %v1677_v35  ;;  %3256 = vmatpush3.bf16.msra.mxu0 %v1677_v35  ;;  %v3583_v35 = vld [vmem:[#allocation13 + $0x38] sm:$0xff]  }
 0x336   : > { %3249 = vmatprep.subr.bf16.mxu1 %v5017_v55  ;;  %3267 = vmatprep.subr.bf16.mxu0 %v5017_v55 }
 0x338   : > { %3240 = vmatmul.mubr.msk.bf16.vlgmr.msra.gmra.mxu1 %vm670_vm1, %v4351_v10 }
 0x339   : > { %3250 = vmatpush3.bf16.msra.mxu1 %v1672_v6  ;;  %3251 = vmatprep.mubr.msk.bf16.mxu1 %vm3958_vm0, %v5017_v55 }
 0x33a   : > { %3258 = vmatmul.mubr.msk.bf16.vlgmr.msra.gmra.mxu0 %vm670_vm1, %v4340_v4  ;;  %3261 = vmatprep.subr.bf16.mxu1 %v5017_v55 }
 0x33b   : > { %3268 = vmatpush3.bf16.msra.mxu0 %v1672_v6  ;;  %3269 = vmatprep.mubr.msk.bf16.mxu0 %vm3958_vm0, %v5017_v55 }
 0x33c   : > { %3279 = vmatprep.subr.bf16.mxu0 %v5017_v55 }
 0x340   : > { %3252 = vmatmul.mubr.msk.bf16.vlgmr.msra.gmra.mxu1 %vm670_vm1, %v4365_v12 }
 0x341   : > { %3262 = vmatpush3.bf16.msra.mxu1 %v1672_v6  ;;  %3263 = vmatprep.mubr.msk.bf16.mxu1 %vm3958_vm0, %v5017_v55 }
 0x342   : > { %3270 = vmatmul.mubr.msk.bf16.vlgmr.msra.gmra.mxu0 %vm670_vm1, %v4358_v11  ;;  %3273 = vmatprep.subr.bf16.mxu1 %v5017_v55 }
 0x343   : > { %3280 = vmatpush3.bf16.msra.mxu0 %v4695_v31  ;;  %3281 = vmatprep.mubr.msk.bf16.mxu0 %vm3958_vm0, %v5017_v55 }
 0x344   : > { %3291 = vmatprep.subr.bf16.mxu0 %v5017_v55 }
 0x348   : > { %3264 = vmatmul.mubr.msk.bf16.vlgmr.msra.gmra.mxu1 %vm670_vm1, %v3582_v0 }
 0x349   : > { %3274 = vmatpush3.bf16.msra.mxu1 %v4703_v58  ;;  %3275 = vmatprep.mubr.msk.bf16.mxu1 %vm3958_vm0, %v5017_v55 }
 0x34a   : > { %3285 = vmatprep.subr.bf16.mxu1 %v5017_v55  ;;  %3282 = vmatmul.mubr.msk.bf16.vlgmr.msra.gmra.mxu0 %vm670_vm1, %v4351_v10 }
 0x34b   : > { %3292 = vmatpush3.bf16.msra.mxu0 %v4379_v15  ;;  %3307 = vmatprep.mubr.msk.bf16.mxu0 %vm3958_vm0, %v5017_v55 }
 0x34c   : > { %3293 = vmatprep.subr.bf16.mxu0 %v5017_v55 }
 0x34f   : > { %3294 = vmatpush3.bf16.msra.mxu0 %v4392_v17 }
 0x350   : > { %3276 = vmatmul.mubr.msk.bf16.vlgmr.msra.gmra.mxu1 %vm670_vm1, %v4351_v10  ;;  %3295 = vmatprep.subr.bf16.mxu0 %v5017_v55 }
 0x351   : > { %3286 = vmatpush3.bf16.msra.mxu1 %v4695_v31  ;;  %3287 = vmatprep.mubr.msk.bf16.mxu1 %vm3958_vm0, %v5017_v55 }
 0x352   : > { %3311 = vmatprep.subr.bf16.mxu1 %v5017_v55 }
 0x353   : > { %3296 = vmatpush3.bf16.msra.mxu0 %v4402_v19 }
 0x354   : > { %3297 = vmatprep.subr.bf16.mxu0 %v5017_v55 }
 0x357   : > { %3298 = vmatpush3.bf16.msra.mxu0 %v4408_v20 }
 0x358   : > { %3288 = vmatmul.mubr.msk.bf16.vlgmr.msra.gmra.mxu1 %vm670_vm1, %v4365_v12  ;;  %3299 = vmatprep.subr.bf16.mxu0 %v5017_v55 }
 0x359   : > { %3312 = vmatpush3.bf16.msra.mxu1 %v4368_v13  ;;  %3327 = vmatprep.mubr.msk.bf16.mxu1 %vm3958_vm0, %v5017_v55 }
 0x35a   : > { %3313 = vmatprep.subr.bf16.mxu1 %v5017_v55 }
 0x35b   : > { %3300 = vmatpush3.bf16.msra.mxu0 %v4413_v21 }
 0x35c   : > { %3301 = vmatprep.subr.bf16.mxu0 %v5017_v55 }
 0x35d   : > { %3314 = vmatpush3.bf16.msra.mxu1 %v4374_v14 }
 0x35e   : > { %3315 = vmatprep.subr.bf16.mxu1 %v5017_v55 }
 0x35f   : > { %3302 = vmatpush3.bf16.msra.mxu0 %v4421_v23 }
 0x360   : > { %3303 = vmatprep.subr.bf16.mxu0 %v5017_v55 }
 0x361   : > { %3316 = vmatpush3.bf16.msra.mxu1 %v4385_v16 }
 0x362   : > { %3317 = vmatprep.subr.bf16.mxu1 %v5017_v55 }
 0x363   : > { %3304 = vmatpush3.bf16.msra.mxu0 %v4429_v25 }
 0x364   : > { %3305 = vmatprep.subr.bf16.mxu0 %v5017_v55 }
 0x365   : > { %3318 = vmatpush3.bf16.msra.mxu1 %v4398_v18 }
 0x366   : > { %3319 = vmatprep.subr.bf16.mxu1 %v5017_v55 }
 0x367   : > { %3306 = vmatpush3.bf16.msra.mxu0 %v4437_v27 }
 0x368   : > { %3331 = vmatprep.subr.bf16.mxu0 %v5017_v55 }
 0x369   : > { %3320 = vmatpush3.bf16.msra.mxu1 %v4415_v22 }
 0x36a   : > { %3321 = vmatprep.subr.bf16.mxu1 %v5017_v55 }
 0x36d   : > { %3322 = vmatpush3.bf16.msra.mxu1 %v4423_v24 }
 0x36e   : > { %3323 = vmatprep.subr.bf16.mxu1 %v5017_v55 }
 0x371   : > { %3324 = vmatpush3.bf16.msra.mxu1 %v4431_v26 }
 0x372   : > { %3325 = vmatprep.subr.bf16.mxu1 %v5017_v55 }
 0x375   : > { %3326 = vmatpush3.bf16.msra.mxu1 %v4439_v28 }
 0x376   : > { %3351 = vmatprep.subr.bf16.mxu1 %v5017_v55 }
 0x392   : > { %v1753_v4 = vpop.f32.mrf.mxu1 }
 0x394   : > { %v3229_v10 = vpop.f32.mrf.mxu1 }
 0x396   : > { %v1756_v11 = vpop.f32.mrf.mxu1 }
 0x398   : > { %v1712_v12 = vpop.f32.mrf.mxu0  ;;  %v3230_v13 = vpop.f32.mrf.mxu1 }
 0x399   : > { %v1754_v14 = vadd.f32 %v1753_v4, %v1712_v12 }
 0x39a   : > { %v3223_v15 = vpop.f32.mrf.mxu0 }
 0x39c   : > { %v1715_v16 = vpop.f32.mrf.mxu0 }
 0x39d   : > { %v1757_v17 = vadd.f32 %v1756_v11, %v1715_v16 }
 0x39e   : > { %v3224_v18 = vpop.f32.mrf.mxu0 }
 0x39f   : > { %v3585_v18 = vld [vmem:[#allocation13 + $0x28] sm:$0xff]  }
 0x3a0   : > { %v1794_v19 = vpop.f32.mrf.mxu0 }
 0x3a1   : > { %v1801_v20 = vadd.f32 %v1794_v19, %v1754_v14  ;;  %v3584_v14 = vld [vmem:[#allocation13 + $0x30] sm:$0xff]  }
 0x3a2   : > { %v3235_v21 = vpop.f32.mrf.mxu0 }
 0x3a3   : > { %v3586_v21 = vld [vmem:[#allocation13 + $0x20] sm:$0xff]  }
 0x3a4   : > { %v1797_v22 = vpop.f32.mrf.mxu0 }
 0x3a5   : > { %v1802_v23 = vadd.f32 %v1797_v22, %v1757_v17 }
 0x3a6   : > { %v3236_v24 = vpop.f32.mrf.mxu0 }
 0x3f2   : > { %v1878_v25 = vpop.f32.mrf.mxu0 }
 0x3f4   : > { %v3247_v26 = vpop.f32.mrf.mxu0 }
 0x3f6   : > { %v1881_v27 = vpop.f32.mrf.mxu0 }
 0x3f8   : > { %v1837_v28 = vpop.f32.mrf.mxu1  ;;  %v3248_v40 = vpop.f32.mrf.mxu0 }
 0x3f9   : > { %v1879_v1 = vadd.f32 %v1878_v25, %v1837_v28 }
 0x3fa   : > { %v3241_v41 = vpop.f32.mrf.mxu1  ;;  %v4798_v44 = vpop.f32.mrf.mxu0 }
 0x3fc   : > { %v1840_v54 = vpop.f32.mrf.mxu1  ;;  %v3259_v5 = vpop.f32.mrf.mxu0 }
 0x3fd   : > { %v1882_v53 = vadd.f32 %v1881_v27, %v1840_v54  ;;  %v3588_v27 = vld [vmem:[#allocation13 + $0x10] sm:$0xff]   ;;  %v3589_v54 = vld [vmem:[#allocation13 + $0x8] sm:$0xff]  }
 0x3fe   : > { %v3242_v31 = vpop.f32.mrf.mxu1  ;;  %v4800_v58 = vpop.f32.mrf.mxu0 }
 0x400   : > { %v1919_v47 = vpop.f32.mrf.mxu1  ;;  %v3260_v52 = vpop.f32.mrf.mxu0 }
 0x401   : > { %v1926_v8 = vadd.f32 %v1919_v47, %v1879_v1 }
 0x402   : > { %v3253_v2 = vpop.f32.mrf.mxu1  ;;  %v4802_v50 = vpop.f32.mrf.mxu0 }
 0x403   : > { %v1928_v46 = vsub.f32 %v1801_v20, %v1926_v8 }
 0x404   : > { %v1922_v7 = vpop.f32.mrf.mxu1  ;;  %v3271_v34 = vpop.f32.mrf.mxu0 }
 0x405   : > { %v1927_v42 = vadd.f32 %v1922_v7, %v1882_v53 }
 0x406   : > { %v3254_v43 = vpop.f32.mrf.mxu1  ;;  %v4804_v45 = vpop.f32.mrf.mxu0 }
 0x407   : > { %v1929_v48 = vsub.f32 %v1802_v23, %v1927_v42  ;;  %v3587_v23 = vld [vmem:[#allocation13 + $0x18] sm:$0xff]  }
 0x408   : > { %v2005_v49 = vpop.f32.mrf.mxu1  ;;  %v3272_v57 = vpop.f32.mrf.mxu0 }
 0x409   : > { %v2182_v60 = vpack.c.bf16 %v1929_v48, %v1928_v46  ;;  %v2006_v28 = vadd.f32 %v2005_v49, %v4798_v44  ;;  %v3590_v44 = vld [vmem:[#allocation13] sm:$0xff]  }
 0x40a   : > { %v3265_v6 = vpop.f32.mrf.mxu1  ;;  %v2130_v29 = vpop.f32.mrf.mxu0 }
 0x40b   : > { %v2183_v30 = vunpack.c.l.bf16 %v2182_v60  ;;  %v2184_v32 = vunpack.c.h.bf16 %v2182_v60  ;;  %3308 = vmatmul.mubr.bf16.vlgmr.msra.gmra.mxu0 %v2182_v60  ;;  %3328 = vmatmul.mubr.bf16.vlgmr.msra.gmra.mxu1 %v2182_v60  ;;  %v2053_v5 = vadd.f32 %v4802_v50, %v2006_v28 }
 0x40c   : > { %3332 = vmatpush3.bf16.msra.mxu0 %v3583_v35  ;;  %3352 = vmatpush3.bf16.msra.mxu1 %v4445_v51  ;;  %v2008_v0 = vpop.f32.mrf.mxu1  ;;  %v3283_v4 = vpop.f32.mrf.mxu0 }
 0x40d   : > { %v4807_v10 = vsub.f32 %v1928_v46, %v2183_v30  ;;  %v4809_v11 = vsub.f32 %v1929_v48, %v2184_v32  ;;  %3333 = vmatprep.subr.bf16.mxu0 %v5017_v55  ;;  %3353 = vmatprep.subr.bf16.mxu1 %v5017_v55  ;;  %v2009_v26 = vadd.f32 %v2008_v0, %v4800_v58 }
 0x40e   : > { %v3266_v12 = vpop.f32.mrf.mxu1  ;;  %v2133_v13 = vpop.f32.mrf.mxu0  ;;  %3347 = vmatprep.mubr.msk.bf16.mxu0 %vm3958_vm0, %v5017_v55  ;;  %3367 = vmatprep.mubr.msk.bf16.mxu1 %vm3958_vm0, %v5017_v55 }
 0x40f   : > { %v2187_v51 = vpack.c.bf16 %v4809_v11, %v4807_v10 }
 0x410   : > { %3334 = vmatpush3.bf16.msra.mxu0 %v3584_v14  ;;  %3354 = vmatpush3.bf16.msra.mxu1 %v4453_v56  ;;  %v2089_v15 = vpop.f32.mrf.mxu1  ;;  %v3284_v16 = vpop.f32.mrf.mxu0  ;;  %v2448_v14 = vld [vmem:[%s498_s12] sm:$0xff] }
 0x411   : > { %3335 = vmatprep.subr.bf16.mxu0 %v5017_v55  ;;  %3355 = vmatprep.subr.bf16.mxu1 %v5017_v55 }
 0x412   : > { %v3277_v17 = vpop.f32.mrf.mxu1 }
 0x414   : > { %3336 = vmatpush3.bf16.msra.mxu0 %v3585_v18  ;;  %3356 = vmatpush3.bf16.msra.mxu1 %v4463_v59  ;;  %v2092_v19 = vpop.f32.mrf.mxu1 }
 0x415   : > { %3337 = vmatprep.subr.bf16.mxu0 %v5017_v55  ;;  %3357 = vmatprep.subr.bf16.mxu1 %v5017_v55  ;;  %v2134_v24 = vadd.f32 %v2133_v13, %v2092_v19 }
 0x416   : > { %v3278_v20 = vpop.f32.mrf.mxu1 }
 0x418   : > { %3338 = vmatpush3.bf16.msra.mxu0 %v3586_v21  ;;  %3358 = vmatpush3.bf16.msra.mxu1 %v4469_v61  ;;  %v2171_v56 = vpop.f32.mrf.mxu1  ;;  %v2131_v61 = vadd.f32 %v2130_v29, %v2089_v15 }
 0x419   : > { %3339 = vmatprep.subr.bf16.mxu0 %v5017_v55  ;;  %3359 = vmatprep.subr.bf16.mxu1 %v5017_v55 }
 0x41a   : > { %v3289_v22 = vpop.f32.mrf.mxu1  ;;  %v2178_v41 = vadd.f32 %v2171_v56, %v2131_v61  ;;  %v2449_v56 = vld [vmem:[%s498_s12 + $0x8] sm:$0xff] }
 0x41c   : > { %3340 = vmatpush3.bf16.msra.mxu0 %v3587_v23  ;;  %3360 = vmatpush3.bf16.msra.mxu1 %v4475_v62  ;;  %v2174_v59 = vpop.f32.mrf.mxu1  ;;  %v2054_v62 = vadd.f32 %v4804_v45, %v2009_v26 }
 0x41d   : > { %3341 = vmatprep.subr.bf16.mxu0 %v5017_v55  ;;  %3361 = vmatprep.subr.bf16.mxu1 %v5017_v55  ;;  %v2179_v40 = vadd.f32 %v2174_v59, %v2134_v24 }
 0x41e   : > { %v3290_v25 = vpop.f32.mrf.mxu1 }
 0x41f   : > { %v2181_v31 = vadd.f32 %v2179_v40, %v2054_v62 }
 0x420   : > { %3342 = vmatpush3.bf16.msra.mxu0 %v3588_v27  ;;  %3362 = vmatpush3.bf16.msra.mxu1 %v4481_v63  ;;  %v2180_v63 = vadd.f32 %v2178_v41, %v2053_v5 }
 0x421   : > { %3343 = vmatprep.subr.bf16.mxu0 %v5017_v55  ;;  %3363 = vmatprep.subr.bf16.mxu1 %v5017_v55 }
 0x422   : > { %v2188_v58 = vpack.c.bf16 %v2181_v31, %v2180_v63 }
 0x424   : > { %3344 = vmatpush3.bf16.msra.mxu0 %v3589_v54  ;;  %3364 = vmatpush3.bf16.msra.mxu1 %v4487_v3  ;;  %v5018_v3 = vld [vmem:[#allocation32_spill] sm:$0xff] }
 0x425   : > { %3345 = vmatprep.subr.bf16.mxu0 %v5017_v55  ;;  %3365 = vmatprep.subr.bf16.mxu1 %v5017_v55 }
 0x428   : > { %3346 = vmatpush3.bf16.msra.mxu0 %v3590_v44  ;;  %3366 = vmatpush3.bf16.msra.mxu1 %v4495_v9  ;;  %v2189_v9 = vunpack.c.l.bf16 %v2188_v58 }
 0x429   : > { %3371 = vmatprep.subr.bf16.mxu0 %v5017_v55  ;;  %3391 = vmatprep.subr.bf16.mxu1 %v5017_v55 }
 0x42b   : > { %3348 = vmatmul.mubr.bf16.vlgmr.msra.gmra.mxu0 %v2187_v51  ;;  %3368 = vmatmul.mubr.bf16.vlgmr.msra.gmra.mxu1 %v2188_v58 }
 0x42c   : > { %3372 = vmatpush3.bf16.msra.mxu0 %v4501_v33  ;;  %3392 = vmatpush3.bf16.msra.mxu1 %v4501_v33  ;;  %v2190_v33 = vunpack.c.h.bf16 %v2188_v58 }
 0x42d   : > { %3373 = vmatprep.subr.bf16.mxu0 %v5017_v55  ;;  %3393 = vmatprep.subr.bf16.mxu1 %v5017_v55 }
 0x42e   : > { %3387 = vmatprep.mubr.msk.bf16.mxu0 %vm3958_vm0, %v5017_v55  ;;  %3407 = vmatprep.mubr.msk.bf16.mxu1 %vm3958_vm0, %v5017_v55 }
 0x430   : > { %3374 = vmatpush3.bf16.msra.mxu0 %v4513_v36  ;;  %3394 = vmatpush3.bf16.msra.mxu1 %v4513_v36  ;;  %v5019_v36 = vld [vmem:[#allocation33_spill] sm:$0xff] }
 0x431   : > { %3375 = vmatprep.subr.bf16.mxu0 %v5017_v55  ;;  %3395 = vmatprep.subr.bf16.mxu1 %v5017_v55 }
 0x434   : > { %3376 = vmatpush3.bf16.msra.mxu0 %v4523_v37  ;;  %3396 = vmatpush3.bf16.msra.mxu1 %v4523_v37  ;;  %v2191_v37 = vsub.f32 %v2180_v63, %v2189_v9 }
 0x435   : > { %3377 = vmatprep.subr.bf16.mxu0 %v5017_v55  ;;  %3397 = vmatprep.subr.bf16.mxu1 %v5017_v55 }
 0x438   : > { %3378 = vmatpush3.bf16.msra.mxu0 %v4529_v38  ;;  %3398 = vmatpush3.bf16.msra.mxu1 %v4529_v38  ;;  %v2192_v38 = vsub.f32 %v2181_v31, %v2190_v33 }
 0x439   : > { %3379 = vmatprep.subr.bf16.mxu0 %v5017_v55  ;;  %3399 = vmatprep.subr.bf16.mxu1 %v5017_v55 }
 0x43a   : > { %v2193_v47 = vpack.c.bf16 %v2192_v38, %v2191_v37 }
 0x43c   : > { %3380 = vmatpush3.bf16.msra.mxu0 %v4535_v39  ;;  %3400 = vmatpush3.bf16.msra.mxu1 %v4535_v39  ;;  %v5020_v39 = vld [vmem:[#allocation34_spill] sm:$0xff] }
 0x43d   : > { %3381 = vmatprep.subr.bf16.mxu0 %v5017_v55  ;;  %3401 = vmatprep.subr.bf16.mxu1 %v5017_v55 }
 0x440   : > { %3382 = vmatpush3.bf16.msra.mxu0 %v5018_v3  ;;  %3402 = vmatpush3.bf16.msra.mxu1 %v5018_v3 }
 0x441   : > { %3383 = vmatprep.subr.bf16.mxu0 %v5017_v55  ;;  %3403 = vmatprep.subr.bf16.mxu1 %v5017_v55 }
 0x444   : > { %3384 = vmatpush3.bf16.msra.mxu0 %v5019_v36  ;;  %3404 = vmatpush3.bf16.msra.mxu1 %v5019_v36 }
 0x445   : > { %3385 = vmatprep.subr.bf16.mxu0 %v5017_v55  ;;  %3405 = vmatprep.subr.bf16.mxu1 %v5017_v55 }
 0x448   : > { %3386 = vmatpush3.bf16.msra.mxu0 %v5020_v39  ;;  %3406 = vmatpush3.bf16.msra.mxu1 %v5020_v39 }
 0x44b   : > { %3388 = vmatmul.mubr.bf16.vlgmr.msra.gmra.mxu0 %v2188_v58  ;;  %3408 = vmatmul.mubr.bf16.vlgmr.msra.gmra.mxu1 %v2193_v47 }
 0x4cb   : > { %v2228_v52 = vpop.f32.mrf.mxu0  ;;  %v2269_v1 = vpop.f32.mrf.mxu1 }
 0x4cc   : > { %v2270_v2 = vadd.f32 %v2269_v1, %v2228_v52 }
 0x4cd   : > { %v3309_v50 = vpop.f32.mrf.mxu0  ;;  %v3329_v53 = vpop.f32.mrf.mxu1 }
 0x4cf   : > { %v2231_v8 = vpop.f32.mrf.mxu0  ;;  %v2272_v7 = vpop.f32.mrf.mxu1 }
 0x4d0   : > { %v2273_v34 = vadd.f32 %v2272_v7, %v2231_v8 }
 0x4d1   : > { %v3310_v42 = vpop.f32.mrf.mxu0  ;;  %v3330_v43 = vpop.f32.mrf.mxu1 }
 0x4eb   : > { %v2310_v45 = vpop.f32.mrf.mxu0  ;;  %v2353_v46 = vpop.f32.mrf.mxu1 }
 0x4ec   : > { %v2317_v4 = vadd.f32 %v2310_v45, %v2270_v2 }
 0x4ed   : > { %v3349_v55 = vpop.f32.mrf.mxu0  ;;  %v3369_v48 = vpop.f32.mrf.mxu1 }
 0x4ef   : > { %v2313_v49 = vpop.f32.mrf.mxu0  ;;  %v2356_v57 = vpop.f32.mrf.mxu1 }
 0x4f0   : > { %v2318_v17 = vadd.f32 %v2313_v49, %v2273_v34 }
 0x4f1   : > { %v3350_v60 = vpop.f32.mrf.mxu0  ;;  %v3370_v6 = vpop.f32.mrf.mxu1 }
 0x50b   : > { %v2394_v29 = vpop.f32.mrf.mxu0  ;;  %v2435_v30 = vpop.f32.mrf.mxu1 }
 0x50c   : > { %v2395_v32 = vadd.f32 %v2394_v29, %v2353_v46 }
 0x50d   : > { %v3389_v35 = vpop.f32.mrf.mxu0  ;;  %v3409_v0 = vpop.f32.mrf.mxu1 }
 0x50e   : > { %v2442_v10 = vadd.f32 %v2435_v30, %v2395_v32 }
 0x50f   : > { %v2397_v11 = vpop.f32.mrf.mxu0  ;;  %v2438_v12 = vpop.f32.mrf.mxu1 }
 0x510   : > { %v2444_v13 = vsub.f32 %v2317_v4, %v2442_v10  ;;  %v2398_v51 = vadd.f32 %v2397_v11, %v2356_v57 }
 0x511   : > { %v3390_v15 = vpop.f32.mrf.mxu0  ;;  %v3410_v16 = vpop.f32.mrf.mxu1 }
 0x512   : > { %v2446_v18 = vmul.f32 0.00390625, %v2444_v13  ;;  %v2443_v19 = vadd.f32 %v2438_v12, %v2398_v51 }
 0x514   : > { %v2450_v20 = vadd.f32 %v2448_v14, %v2446_v18  ;;  %v2445_v21 = vsub.f32 %v2318_v17, %v2443_v19 }
 0x516   : > { %2452 = vst [vmem:[%s583_s30] sm:$0xff] %v2450_v20  ;;  %v2447_v22 = vmul.f32 0.00390625, %v2445_v21 }
 0x518   : > { %v2451_v23 = vadd.f32 %v2449_v56, %v2447_v22 }
 0x51a   : > { %2453 = vst [vmem:[%s583_s30 + $0x8] sm:$0xff] %v2451_v23 }
 0x51b   : > { %3870 = shalt.err (!%p3867_p6)
}
 0x51c   : > { %s3871_s13 = scalar_lea.hbm %s4889_s6, 256  ;;  %s3875_s12 = scalar_lea.hbm %s5022_s21, 512 }
 0x51d   : > { %p3872_p7 = scmp.ne.s32.totalorder %s4889_s6, %s3871_s13  ;;  %p3876_p0 = scmp.lt.s32.totalorder %s4889_s6, %s5022_s21 }
 0x51e   : > { %p3877_p2 = scmp.lt.s32.totalorder %s3875_s12, %s3871_s13 }
 0x51f   : > { %p3873_p8 = pnand %p3872_p7, %p5023_p5 }
 0x520   : > { %p3878_p10 = por %p3877_p2, %p3876_p0 }
 0x521   : > { %p3874_p9 = pneg %p3873_p8 }
 0x523   : > { %p3879_p3 = pnand %p3878_p10, %p3874_p9 }
 0x525   : > { %3882 = shalt.err (!%p3879_p3)
}
 0x526   : > { %s3960_s17 = smov 128   ;;  %s3961_s30 = smov 8  }
 0x527   : > { %3445 = dma.vmem_to_hbm [thread:$0]  (%p5023_p5), %s4884_s27, 256, %s4889_s6, %s2455_s8, %s3960_s17, %s3960_s17, %s3961_s30  }
 0x528 PF: > { %s5024_s25 = sld [smem:[#allocation27_spill]] }
 0x529   : > { %s5025_s14 = sld [smem:[#allocation31_spill]] }
 0x52a   : > { %s5026_s11 = sld [smem:[#allocation28_spill]] }
 0x52e   : > { %s2483_s20 = sand.u32 1, %s5024_s25  }
 0x52f   : > { %p5027_p4 = scmp.ne.s32.totalorder %s5025_s14, 0  ;;  %s2484_s3 = scalar_lea.sflag [#allocation4], %s2483_s20 }
 0x530   : > { %p5028_p13 = scmp.ge.s32.totalorder %s5026_s11, 2 }
 0x532   : > { %p3480_p11 = pnand %p5028_p13, %p5027_p4 }
 0x534   : > { %p3481_p1 = pneg %p3480_p11 }
 0x536   : > { %3924 = dma.done.wait (%p3481_p1), %s2484_s3, 256  }
 0x537   : > { %3926 = vsyncadd (%p3481_p1), %s2484_s3, 4294967040  ;;  %s5029_s20 = sld [smem:[#allocation29_spill]]  ;;  %s5031_s17 = smov %s3933_s18 }
 0x538   : > { %s5030_s23 = sld [smem:[#allocation30_spill]]  ;;  %s5032_s18 = smov %s3937_s19 }
 0x53d   : > { %p31_p12 = scmp.ge.s32.totalorder %s5029_s20, 4  }
 0x53e   : > { %s5033_s19 = smov %s5030_s23 }
 0x53f   :  { %33 = sbr.rel (!%p31_p12) target bundleno = 17 (0x11), region = 161 }
 0x544   :  { %2489 = vsyncpa [#allocation3], 1 }
 0x545   :  { %2491 = vsyncpa [#allocation3 + $0x1], 1 }
 0x546   :  { %2492 = vsyncpa [#allocation6], 1 }
 0x547   :  { %2494 = vsyncpa [#allocation6 + $0x1], 1 }
 0x548   :  { %2495 = vsyncpa [#allocation9], 1 }
 0x549   :  { %2496 = vsyncpa [#allocation12], 1 }
 0x54a   :  { %2497 = vsyncpa [#allocation15], 1 }
 0x54b   :  { %2498 = vsyncpa [#allocation18], 1 }
 0x54c   :  { %2499 = vsyncpa [#allocation4], 1 }
 0x54d   :  { %2501 = vsyncpa [#allocation4 + $0x1], 1 }

</bundles_post_ra>
